<compile_context>
chip_gen: v7x
topology: tpu7x:2x2x1
jax: 0.10.0
libtpu: 0.0.40
codegen_flags: <defaults>
</compile_context>

<pallas_src>
import functools

import jax
import jax.numpy as jnp
from jax.experimental import pallas as pl
from jax.experimental.pallas import tpu as pltpu

_LANE = 128


def _round_up(x, m):
    return (x + m - 1) // m * m


def _fused_sage_kernel(*refs, n_layers):
    # refs = (a, inv_deg, x, [ws_l, wn_l, b_l for each layer], out)
    #   a:       (Np, Np)        bf16 binary (0/1) in-neighbor adjacency
    #   inv_deg: (Np, 1)         f32  reciprocal in-degree (exact mean weights)
    #   x:       (Np, F0p)       bf16 zero-padded input features
    #   ws_l/wn_l: (Fin_p, Fout_p) bf16 per-layer weights (in x out), zero pad
    #   b_l:     (1, Fout_p)     f32  per-layer bias
    #   out:     (Np, FLp)       f32  final layer output (padded)
    a_ref, inv_deg_ref, x_ref = refs[0], refs[1], refs[2]
    o_ref = refs[-1]
    layer_refs = refs[3:-1]

    a = a_ref[...]                          # bf16, exact 0/1 values
    inv_deg = inv_deg_ref[...]              # f32 (Np, 1)
    h = x_ref[...]                          # bf16 MXU operand

    for l in range(n_layers):               # unrolled; static per-layer shapes
        ws = layer_refs[3 * l][...]         # (Fin_p, Fout_p) bf16
        wn = layer_refs[3 * l + 1][...]     # (Fin_p, Fout_p) bf16
        b = layer_refs[3 * l + 2][...]      # (1, Fout_p)     f32

        # self projection (MXU, f32 accumulate)
        out = jnp.dot(h, ws, preferred_element_type=jnp.float32)
        # (A_norm @ H) @ Wn == D^-1 (A @ (H @ Wn)): project first, aggregate the
        # narrow projected result, then apply the exact f32 1/deg row scale.
        hwn = jnp.dot(h, wn, preferred_element_type=jnp.float32)
        agg = jnp.dot(a, hwn.astype(jnp.bfloat16),
                      preferred_element_type=jnp.float32)
        out = out + inv_deg * agg + b       # f32 VPU: scale + bias

        if l != n_layers - 1:
            out = jnp.maximum(out, 0.0)     # f32 ReLU (VPU)
            h = out.astype(jnp.bfloat16)    # next layer's MXU operand
        else:
            o_ref[...] = out.astype(o_ref.dtype)


def sage_forward(adj_binary, in_deg, x, params):
    """Full SAGE stack as a single fused, fully VMEM-resident Pallas kernel.

    adj_binary: (N, N) dense 0/1 in-neighbor adjacency (A[i, j] = 1 iff j -> i).
    in_deg:     (N, 1) in-degrees (row sums of adj_binary).
    x:          (N, F_in) node features.
    params:     list of (W_self (in,out), W_neigh (in,out), bias (out,)) per layer.
    """
    n_nodes, in_feats = x.shape
    n_layers = len(params)
    n_classes = params[-1][0].shape[1]

    # Lane-dense node axis: A's last dim is both a lane axis and the contraction
    # dim of the aggregation matmul.
    n_pad = _round_up(n_nodes, _LANE)

    dims = [in_feats] + [w.shape[1] for w, _, _ in params]
    pads = [_round_up(d, _LANE) for d in dims]      # per-layer padded widths

    a_pad = jnp.pad(adj_binary, ((0, n_pad - n_nodes), (0, n_pad - n_nodes))
                    ).astype(jnp.bfloat16)
    inv_deg_pad = jnp.pad(1.0 / jnp.maximum(in_deg, 1.0),
                          ((0, n_pad - n_nodes), (0, 0))).astype(jnp.float32)
    x_pad = jnp.pad(x, ((0, n_pad - n_nodes), (0, pads[0] - in_feats))
                    ).astype(jnp.bfloat16)

    inputs = [a_pad, inv_deg_pad, x_pad]
    for l, (ws, wn, b) in enumerate(params):
        fi, fo = ws.shape
        fi_p, fo_p = pads[l], pads[l + 1]
        inputs.append(jnp.pad(ws, ((0, fi_p - fi), (0, fo_p - fo))
                              ).astype(jnp.bfloat16))
        inputs.append(jnp.pad(wn, ((0, fi_p - fi), (0, fo_p - fo))
                              ).astype(jnp.bfloat16))
        inputs.append(jnp.pad(b, (0, fo_p - fo)).reshape(1, fo_p)
                      .astype(jnp.float32))

    out_shape = jax.ShapeDtypeStruct((n_pad, pads[-1]), jnp.float32)

    # Size the VMEM limit from the actual operands (+ headroom for the in-kernel
    # f32 intermediates) instead of a hardcoded constant.
    operand_bytes = sum(int(t.size) * t.dtype.itemsize for t in inputs)
    operand_bytes += n_pad * pads[-1] * 4                       # output
    scratch_bytes = 8 * n_pad * max(pads) * 4                   # intermediates
    vmem_limit = int(1.25 * (operand_bytes + scratch_bytes))
    vmem_limit = min(max(vmem_limit, 32 * 1024 * 1024), 64 * 1024 * 1024)

    kernel = functools.partial(_fused_sage_kernel, n_layers=n_layers)
    vmem_spec = pl.BlockSpec(memory_space=pltpu.MemorySpace.VMEM)

    out_pad = pl.pallas_call(
        kernel,
        out_shape=out_shape,
        in_specs=[vmem_spec] * len(inputs),
        out_specs=vmem_spec,
        compiler_params=pltpu.CompilerParams(vmem_limit_bytes=vmem_limit),
    )(*inputs)

    return out_pad[:n_nodes, :n_classes]


def sage_reference(a_norm, x, params):
    """Pure-JAX f32 reference for tolerance checking the bf16 MXU path."""
    h = x
    n_layers = len(params)
    for l, (ws, wn, b) in enumerate(params):
        h = h @ ws + (a_norm @ h) @ wn + b
        if l != n_layers - 1:
            h = jnp.maximum(h, 0.0)
    return h


def init_sage_params(key, in_feats, n_hidden, n_classes, n_layers):
    """Deterministic Xavier-style init; weights stored as (in, out)."""
    dims = [in_feats] + [n_hidden] * (n_layers - 1) + [n_classes]
    params = []
    for l in range(n_layers):
        f_in, f_out = dims[l], dims[l + 1]
        key, k1, k2 = jax.random.split(key, 3)
        scale = jnp.sqrt(2.0 / (f_in + f_out)).astype(jnp.float32)
        w_self = jax.random.normal(k1, (f_in, f_out), jnp.float32) * scale
        w_neigh = jax.random.normal(k2, (f_in, f_out), jnp.float32) * scale
        b = jnp.zeros((f_out,), jnp.float32)
        params.append((w_self, w_neigh, b))
    return params


def build_binary_adjacency(key, n_nodes, edge_prob=0.15):
    """Dense 0/1 in-neighbor adjacency (no self loops) and its in-degrees."""
    adj = (jax.random.uniform(key, (n_nodes, n_nodes)) < edge_prob
           ).astype(jnp.float32)
    adj = adj * (1.0 - jnp.eye(n_nodes, dtype=jnp.float32))
    in_deg = adj.sum(axis=1, keepdims=True)
    return adj, in_deg


if __name__ == "__main__":
    key = jax.random.PRNGKey(0)
    k_adj, k_feat, k_par = jax.random.split(key, 3)

    # Small shapes consistent with the module: 64 nodes, 32 input feats,
    # 32 hidden, 16 classes, 3 SAGEConv layers, ReLU activation, mean agg.
    N_NODES, IN_FEATS, N_HIDDEN, N_CLASSES, N_LAYERS = 64, 32, 32, 16, 3

    adj, in_deg = build_binary_adjacency(k_adj, N_NODES)
    x = jax.random.normal(k_feat, (N_NODES, IN_FEATS), jnp.float32)
    params = init_sage_params(k_par, IN_FEATS, N_HIDDEN, N_CLASSES, N_LAYERS)

    out = jax.block_until_ready(sage_forward(adj, in_deg, x, params))
    assert out.shape == (N_NODES, N_CLASSES), out.shape
    assert bool(jnp.all(jnp.isfinite(out)))

    # Tolerance check of the bf16-operand / f32-accumulate kernel vs f32 reference.
    a_norm = adj / jnp.maximum(in_deg, 1.0)
    ref = sage_reference(a_norm, x, params)
    assert jnp.allclose(out, ref, rtol=1e-1, atol=1e-1), \
        float(jnp.max(jnp.abs(out - ref)))

    print("KERNEL_OK")
</pallas_src>

<mosaic_0001>
module attributes {stable_mosaic.version = 11 : i64} {
  func.func @_fused_sage_kernel(%arg0: memref<128x128xbf16, #tpu.memory_space<vmem>>, %arg1: memref<128x1xf32, #tpu.memory_space<vmem>>, %arg2: memref<128x128xbf16, #tpu.memory_space<vmem>>, %arg3: memref<128x128xbf16, #tpu.memory_space<vmem>>, %arg4: memref<128x128xbf16, #tpu.memory_space<vmem>>, %arg5: memref<1x128xf32, #tpu.memory_space<vmem>>, %arg6: memref<128x128xbf16, #tpu.memory_space<vmem>>, %arg7: memref<128x128xbf16, #tpu.memory_space<vmem>>, %arg8: memref<1x128xf32, #tpu.memory_space<vmem>>, %arg9: memref<128x128xbf16, #tpu.memory_space<vmem>>, %arg10: memref<128x128xbf16, #tpu.memory_space<vmem>>, %arg11: memref<1x128xf32, #tpu.memory_space<vmem>>, %arg12: memref<128x128xf32, #tpu.memory_space<vmem>>) attributes {dimension_semantics = [], scalar_prefetch = 0 : i64, scratch_operands = 0 : i64, tpu.core_type = #tpu.core_type<tc>} {
    %c0 = arith.constant 0 : index
    %c0_0 = arith.constant 0 : index
    %0 = vector.load %arg0[%c0, %c0_0] : memref<128x128xbf16, #tpu.memory_space<vmem>>, vector<128x128xbf16>
    %c0_1 = arith.constant 0 : index
    %c0_2 = arith.constant 0 : index
    %1 = vector.load %arg1[%c0_1, %c0_2] : memref<128x1xf32, #tpu.memory_space<vmem>>, vector<128x1xf32>
    %c0_3 = arith.constant 0 : index
    %c0_4 = arith.constant 0 : index
    %2 = vector.load %arg2[%c0_3, %c0_4] : memref<128x128xbf16, #tpu.memory_space<vmem>>, vector<128x128xbf16>
    %c0_5 = arith.constant 0 : index
    %c0_6 = arith.constant 0 : index
    %3 = vector.load %arg3[%c0_5, %c0_6] : memref<128x128xbf16, #tpu.memory_space<vmem>>, vector<128x128xbf16>
    %c0_7 = arith.constant 0 : index
    %c0_8 = arith.constant 0 : index
    %4 = vector.load %arg4[%c0_7, %c0_8] : memref<128x128xbf16, #tpu.memory_space<vmem>>, vector<128x128xbf16>
    %c0_9 = arith.constant 0 : index
    %c0_10 = arith.constant 0 : index
    %5 = vector.load %arg5[%c0_9, %c0_10] : memref<1x128xf32, #tpu.memory_space<vmem>>, vector<1x128xf32>
    %cst = arith.constant dense<0.000000e+00> : vector<128x128xf32>
    %6 = tpu.matmul %2, %3, %cst {dimension_numbers = #tpu.dot_dimension_numbers<[1], [0], [0], [1], [0, 0, 1, 1], [], []>} : vector<128x128xbf16>, vector<128x128xbf16>, vector<128x128xf32> -> vector<128x128xf32>
    %cst_11 = arith.constant dense<0.000000e+00> : vector<128x128xf32>
    %7 = tpu.matmul %2, %4, %cst_11 {dimension_numbers = #tpu.dot_dimension_numbers<[1], [0], [0], [1], [0, 0, 1, 1], [], []>} : vector<128x128xbf16>, vector<128x128xbf16>, vector<128x128xf32> -> vector<128x128xf32>
    %8 = arith.truncf %7 : vector<128x128xf32> to vector<128x128xbf16>
    %cst_12 = arith.constant dense<0.000000e+00> : vector<128x128xf32>
    %9 = tpu.matmul %0, %8, %cst_12 {dimension_numbers = #tpu.dot_dimension_numbers<[1], [0], [0], [1], [0, 0, 1, 1], [], []>} : vector<128x128xbf16>, vector<128x128xbf16>, vector<128x128xf32> -> vector<128x128xf32>
    %10 = vector.broadcast %1 : vector<128x1xf32> to vector<128x128xf32>
    %11 = arith.mulf %10, %9 : vector<128x128xf32>
    %12 = arith.addf %6, %11 : vector<128x128xf32>
    %13 = vector.broadcast %5 : vector<1x128xf32> to vector<128x128xf32>
    %14 = arith.addf %12, %13 : vector<128x128xf32>
    %cst_13 = arith.constant 0.000000e+00 : f32
    %15 = vector.broadcast %cst_13 : f32 to vector<128x128xf32>
    %16 = arith.maximumf %14, %15 : vector<128x128xf32>
    %17 = arith.truncf %16 : vector<128x128xf32> to vector<128x128xbf16>
    %c0_14 = arith.constant 0 : index
    %c0_15 = arith.constant 0 : index
    %18 = vector.load %arg6[%c0_14, %c0_15] : memref<128x128xbf16, #tpu.memory_space<vmem>>, vector<128x128xbf16>
    %c0_16 = arith.constant 0 : index
    %c0_17 = arith.constant 0 : index
    %19 = vector.load %arg7[%c0_16, %c0_17] : memref<128x128xbf16, #tpu.memory_space<vmem>>, vector<128x128xbf16>
    %c0_18 = arith.constant 0 : index
    %c0_19 = arith.constant 0 : index
    %20 = vector.load %arg8[%c0_18, %c0_19] : memref<1x128xf32, #tpu.memory_space<vmem>>, vector<1x128xf32>
    %cst_20 = arith.constant dense<0.000000e+00> : vector<128x128xf32>
    %21 = tpu.matmul %17, %18, %cst_20 {dimension_numbers = #tpu.dot_dimension_numbers<[1], [0], [0], [1], [0, 0, 1, 1], [], []>} : vector<128x128xbf16>, vector<128x128xbf16>, vector<128x128xf32> -> vector<128x128xf32>
    %cst_21 = arith.constant dense<0.000000e+00> : vector<128x128xf32>
    %22 = tpu.matmul %17, %19, %cst_21 {dimension_numbers = #tpu.dot_dimension_numbers<[1], [0], [0], [1], [0, 0, 1, 1], [], []>} : vector<128x128xbf16>, vector<128x128xbf16>, vector<128x128xf32> -> vector<128x128xf32>
    %23 = arith.truncf %22 : vector<128x128xf32> to vector<128x128xbf16>
    %cst_22 = arith.constant dense<0.000000e+00> : vector<128x128xf32>
    %24 = tpu.matmul %0, %23, %cst_22 {dimension_numbers = #tpu.dot_dimension_numbers<[1], [0], [0], [1], [0, 0, 1, 1], [], []>} : vector<128x128xbf16>, vector<128x128xbf16>, vector<128x128xf32> -> vector<128x128xf32>
    %25 = vector.broadcast %1 : vector<128x1xf32> to vector<128x128xf32>
    %26 = arith.mulf %25, %24 : vector<128x128xf32>
    %27 = arith.addf %21, %26 : vector<128x128xf32>
    %28 = vector.broadcast %20 : vector<1x128xf32> to vector<128x128xf32>
    %29 = arith.addf %27, %28 : vector<128x128xf32>
    %cst_23 = arith.constant 0.000000e+00 : f32
    %30 = vector.broadcast %cst_23 : f32 to vector<128x128xf32>
    %31 = arith.maximumf %29, %30 : vector<128x128xf32>
    %32 = arith.truncf %31 : vector<128x128xf32> to vector<128x128xbf16>
    %c0_24 = arith.constant 0 : index
    %c0_25 = arith.constant 0 : index
    %33 = vector.load %arg9[%c0_24, %c0_25] : memref<128x128xbf16, #tpu.memory_space<vmem>>, vector<128x128xbf16>
    %c0_26 = arith.constant 0 : index
    %c0_27 = arith.constant 0 : index
    %34 = vector.load %arg10[%c0_26, %c0_27] : memref<128x128xbf16, #tpu.memory_space<vmem>>, vector<128x128xbf16>
    %c0_28 = arith.constant 0 : index
    %c0_29 = arith.constant 0 : index
    %35 = vector.load %arg11[%c0_28, %c0_29] : memref<1x128xf32, #tpu.memory_space<vmem>>, vector<1x128xf32>
    %cst_30 = arith.constant dense<0.000000e+00> : vector<128x128xf32>
    %36 = tpu.matmul %32, %33, %cst_30 {dimension_numbers = #tpu.dot_dimension_numbers<[1], [0], [0], [1], [0, 0, 1, 1], [], []>} : vector<128x128xbf16>, vector<128x128xbf16>, vector<128x128xf32> -> vector<128x128xf32>
    %cst_31 = arith.constant dense<0.000000e+00> : vector<128x128xf32>
    %37 = tpu.matmul %32, %34, %cst_31 {dimension_numbers = #tpu.dot_dimension_numbers<[1], [0], [0], [1], [0, 0, 1, 1], [], []>} : vector<128x128xbf16>, vector<128x128xbf16>, vector<128x128xf32> -> vector<128x128xf32>
    %38 = arith.truncf %37 : vector<128x128xf32> to vector<128x128xbf16>
    %cst_32 = arith.constant dense<0.000000e+00> : vector<128x128xf32>
    %39 = tpu.matmul %0, %38, %cst_32 {dimension_numbers = #tpu.dot_dimension_numbers<[1], [0], [0], [1], [0, 0, 1, 1], [], []>} : vector<128x128xbf16>, vector<128x128xbf16>, vector<128x128xf32> -> vector<128x128xf32>
    %40 = vector.broadcast %1 : vector<128x1xf32> to vector<128x128xf32>
    %41 = arith.mulf %40, %39 : vector<128x128xf32>
    %42 = arith.addf %36, %41 : vector<128x128xf32>
    %43 = vector.broadcast %35 : vector<1x128xf32> to vector<128x128xf32>
    %44 = arith.addf %42, %43 : vector<128x128xf32>
    %c0_33 = arith.constant 0 : index
    %c0_34 = arith.constant 0 : index
    %45 = vector.load %arg12[%c0_33, %c0_34] : memref<128x128xf32, #tpu.memory_space<vmem>>, vector<128x128xf32>
    tpu.vector_store %arg12[%c0_33, %c0_34], %44 {strides = array<i32>} : memref<128x128xf32, #tpu.memory_space<vmem>>, vector<128x128xf32>,
    return
  }
}

</mosaic_0001>

<bundles_post_ra>
// kernel: tpu_custom_call.1
= control target key start
LH: loop header
LB: loop body
LE: loop exit
PB: predicated region body
PF: predicated region fallthrough
CT: control target
= control target key end

     0   :  { %17 = vsyncpa [#allocation3], 0  ;;  %s3219_s0 = inlined_call_operand.vmem [shape: bf16[128,128], index: 0, kind: input, shape index: {}]   ;;  %s3220_s1 = inlined_call_operand.vmem [shape: f32[128,1], index: 1, kind: input, shape index: {}]   ;;  %s3221_s2 = inlined_call_operand.vmem [shape: bf16[128,128], index: 2, kind: input, shape index: {}]   ;;  %s3222_s3 = inlined_call_operand.hbm [shape: bf16[128,128], index: 3, kind: input, shape index: {}]   ;;  %s3223_s4 = inlined_call_operand.hbm [shape: bf16[128,128], index: 4, kind: input, shape index: {}]   ;;  %s3224_s5 = inlined_call_operand.vmem [shape: f32[1,128], index: 5, kind: input, shape index: {}]   ;;  %s3225_s6 = inlined_call_operand.hbm [shape: bf16[128,128], index: 6, kind: input, shape index: {}]   ;;  %s3226_s7 = inlined_call_operand.hbm [shape: bf16[128,128], index: 7, kind: input, shape index: {}]   ;;  %s3227_s8 = inlined_call_operand.vmem [shape: f32[1,128], index: 8, kind: input, shape index: {}]   ;;  %s3228_s9 = inlined_call_operand.hbm [shape: bf16[128,128], index: 9, kind: input, shape index: {}]   ;;  %s3229_s10 = inlined_call_operand.hbm [shape: bf16[128,128], index: 10, kind: input, shape index: {}]   ;;  %s3230_s11 = inlined_call_operand.vmem [shape: f32[1,128], index: 11, kind: input, shape index: {}]   ;;  %s3231_s12 = inlined_call_operand.hbm [shape: f32[128,128], index: 12, kind: output, shape index: {}]  }
   0x1   :  { %18 = vsyncpa [#allocation6], 0 }
   0x2   :  { %19 = vsyncpa [#allocation9], 0 }
   0x3   :  { %20 = vsyncpa [#allocation12], 0 }
   0x4   :  { %21 = vsyncpa [#allocation4], 0  ;;  %s2588_s21 = smov [#allocation5]   ;;  %s2589_s23 = smov [#allocation8]  }
   0x5   :  { %s45_s22 = sshll.u32 %s2588_s21, 4  ;;  %s71_s24 = sshll.u32 %s2589_s23, 4  ;;  %s46_s22 = int_to_ptr.vmem [resolvable:$true] %s45_s22  ;;  %s2665_s24 = int_to_ptr.vmem [resolvable:$true] %s71_s24 }
   0x6   :  { %s2424_s27 = scalar_lea.hbm %s3223_s4, 1024 }
   0x7   :  { %p2425_p0 = scmp.ne.s32.totalorder %s3223_s4, %s2424_s27  ;;  %p2428_p1 = scmp.lt.u32.totalorder %s2424_s27, %s3223_s4 }
   0x9   :  { %p2430_p2 = pnand %p2428_p1, %p2425_p0 }
   0xb   :  { %2433 = shalt.err (!%p2430_p2)
}
   0xc   :  { %s2434_s14 = scalar_lea.vmem %s46_s22, 1024  ;;  %p2439_p4 = scmp.lt.s32.totalorder %s46_s22, %s46_s22 }
   0xd   :  { %p2435_p3 = scmp.ne.s32.totalorder %s46_s22, %s2434_s14  ;;  %p2440_p5 = scmp.lt.s32.totalorder %s2434_s14, %s2434_s14 }
   0xf   :  { %p2441_p6 = por %p2440_p5, %p2439_p4 }
  0x11   :  { %p2442_p7 = pnand %p2441_p6, %p2435_p3 }
  0x13   :  { %2445 = shalt.err (!%p2442_p7)
}
  0x14   :  { %s2590_s15 = smov 64   ;;  %s2591_s16 = smov 4  }
  0x15   :  { %51 = dma.hbm_to_vmem [thread:$0]  %s3223_s4, 1024, %s46_s22, [#allocation6], %s2590_s15, %s2590_s15, %s2591_s16  }
  0x16   :  { %s2446_s21 = scalar_lea.hbm %s3226_s7, 1024 }
  0x17   :  { %p2447_p8 = scmp.ne.s32.totalorder %s3226_s7, %s2446_s21  ;;  %p2450_p9 = scmp.lt.u32.totalorder %s2446_s21, %s3226_s7 }
  0x19   :  { %p2452_p10 = pnand %p2450_p9, %p2447_p8 }
  0x1b   :  { %2455 = shalt.err (!%p2452_p10)
}
  0x1c   :  { %s2456_s28 = scalar_lea.vmem %s2665_s24, 1024  ;;  %p2461_p12 = scmp.lt.s32.totalorder %s2665_s24, %s2665_s24 }
  0x1d   :  { %p2457_p11 = scmp.ne.s32.totalorder %s2665_s24, %s2456_s28  ;;  %p2462_p13 = scmp.lt.s32.totalorder %s2456_s28, %s2456_s28 }
  0x1f   :  { %p2463_p0 = por %p2462_p13, %p2461_p12 }
  0x21   :  { %p2464_p1 = pnand %p2463_p0, %p2457_p11 }
  0x23   :  { %2467 = shalt.err (!%p2464_p1)
}
  0x24   :  { %77 = dma.hbm_to_vmem [thread:$0]  %s3226_s7, 1024, %s2665_s24, [#allocation9], %s2590_s15, %s2590_s15, %s2591_s16  }
  0x25   :  { %s2592_s29 = smov [#allocation2]   ;;  %s2593_s13 = smov [#allocation7]  }
  0x26   :  { %s33_s30 = sshll.u32 %s2592_s29, 4  ;;  %s59_s14 = sshll.u32 %s2593_s13, 4  ;;  %s34_s30 = int_to_ptr.vmem [resolvable:$true] %s33_s30  ;;  %s2702_s14 = int_to_ptr.vmem [resolvable:$true] %s59_s14 }
  0x27   :  { %s2468_s19 = scalar_lea.hbm %s3222_s3, 1024 }
  0x28   :  { %p2469_p2 = scmp.ne.s32.totalorder %s3222_s3, %s2468_s19  ;;  %p2472_p3 = scmp.lt.u32.totalorder %s2468_s19, %s3222_s3 }
  0x2a   :  { %p2474_p4 = pnand %p2472_p3, %p2469_p2 }
  0x2c   :  { %2477 = shalt.err (!%p2474_p4)
}
  0x2d   :  { %s2478_s7 = scalar_lea.vmem %s34_s30, 1024  ;;  %p2483_p6 = scmp.lt.s32.totalorder %s34_s30, %s34_s30 }
  0x2e   :  { %p2479_p5 = scmp.ne.s32.totalorder %s34_s30, %s2478_s7  ;;  %p2484_p7 = scmp.lt.s32.totalorder %s2478_s7, %s2478_s7 }
  0x30   :  { %p2485_p8 = por %p2484_p7, %p2483_p6 }
  0x32   :  { %p2486_p9 = pnand %p2485_p8, %p2479_p5 }
  0x34   :  { %2489 = shalt.err (!%p2486_p9)
}
  0x35   :  { %39 = dma.hbm_to_vmem [thread:$0]  %s3222_s3, 1024, %s34_s30, [#allocation3], %s2590_s15, %s2590_s15, %s2591_s16  }
  0x36   :  { %s2490_s4 = scalar_lea.hbm %s3225_s6, 1024 }
  0x37   :  { %p2491_p10 = scmp.ne.s32.totalorder %s3225_s6, %s2490_s4  ;;  %p2494_p11 = scmp.lt.u32.totalorder %s2490_s4, %s3225_s6 }
  0x39   :  { %p2496_p12 = pnand %p2494_p11, %p2491_p10 }
  0x3b   :  { %2499 = shalt.err (!%p2496_p12)
}
  0x3c   :  { %s2500_s18 = scalar_lea.vmem %s2702_s14, 1024  ;;  %p2505_p0 = scmp.lt.s32.totalorder %s2702_s14, %s2702_s14 }
  0x3d   :  { %p2501_p13 = scmp.ne.s32.totalorder %s2702_s14, %s2500_s18  ;;  %p2506_p1 = scmp.lt.s32.totalorder %s2500_s18, %s2500_s18 }
  0x3f   :  { %p2507_p2 = por %p2506_p1, %p2505_p0 }
  0x41   :  { %p2508_p3 = pnand %p2507_p2, %p2501_p13 }
  0x43   :  { %2511 = shalt.err (!%p2508_p3)
}
  0x44   :  { %65 = dma.hbm_to_vmem [thread:$0]  %s3225_s6, 1024, %s2702_s14, [#allocation6], %s2590_s15, %s2590_s15, %s2591_s16  }
  0x45   :  { %s2594_s19 = smov [#allocation10]   ;;  %s2595_s21 = smov [#allocation11]  }
  0x46   :  { %s85_s20 = sshll.u32 %s2594_s19, 4  ;;  %s97_s23 = sshll.u32 %s2595_s21, 4  ;;  %s86_s20 = int_to_ptr.vmem [resolvable:$true] %s85_s20  ;;  %s2739_s23 = int_to_ptr.vmem [resolvable:$true] %s97_s23 }
  0x47   :  { %s2512_s24 = scalar_lea.hbm %s3228_s9, 1024 }
  0x48   :  { %p2513_p4 = scmp.ne.s32.totalorder %s3228_s9, %s2512_s24  ;;  %p2516_p5 = scmp.lt.u32.totalorder %s2512_s24, %s3228_s9 }
  0x4a   :  { %p2518_p6 = pnand %p2516_p5, %p2513_p4 }
  0x4c   :  { %2521 = shalt.err (!%p2518_p6)
}
  0x4d   :  { %s2522_s6 = scalar_lea.vmem %s86_s20, 1024  ;;  %p2527_p8 = scmp.lt.s32.totalorder %s86_s20, %s86_s20 }
  0x4e   :  { %p2523_p7 = scmp.ne.s32.totalorder %s86_s20, %s2522_s6  ;;  %p2528_p9 = scmp.lt.s32.totalorder %s2522_s6, %s2522_s6 }
  0x50   :  { %p2529_p10 = por %p2528_p9, %p2527_p8 }
  0x52   :  { %p2530_p11 = pnand %p2529_p10, %p2523_p7 }
  0x54   :  { %2533 = shalt.err (!%p2530_p11)
}
  0x55   :  { %91 = dma.hbm_to_vmem [thread:$0]  %s3228_s9, 1024, %s86_s20, [#allocation9], %s2590_s15, %s2590_s15, %s2591_s16  }
  0x56   :  { %s2534_s17 = scalar_lea.hbm %s3229_s10, 1024 }
  0x57   :  { %p2535_p12 = scmp.ne.s32.totalorder %s3229_s10, %s2534_s17  ;;  %p2538_p13 = scmp.lt.u32.totalorder %s2534_s17, %s3229_s10 }
  0x59   :  { %p2540_p0 = pnand %p2538_p13, %p2535_p12 }
  0x5b   :  { %2543 = shalt.err (!%p2540_p0)
}
  0x5c   :  { %s2544_s21 = scalar_lea.vmem %s2739_s23, 1024  ;;  %p2549_p2 = scmp.lt.s32.totalorder %s2739_s23, %s2739_s23 }
  0x5d   :  { %p2545_p1 = scmp.ne.s32.totalorder %s2739_s23, %s2544_s21  ;;  %p2550_p3 = scmp.lt.s32.totalorder %s2544_s21, %s2544_s21 }
  0x5f   :  { %p2551_p4 = por %p2550_p3, %p2549_p2 }
  0x61   :  { %p2552_p5 = pnand %p2551_p4, %p2545_p1 }
  0x63   :  { %2555 = shalt.err (!%p2552_p5)
}
  0x64   :  { %103 = dma.hbm_to_vmem [thread:$0]  %s3229_s10, 1024, %s2739_s23, [#allocation12], %s2590_s15, %s2590_s15, %s2591_s16  }
  0x65   :  { %2578 = dma.done.wait [#allocation3], 1024  }
  0x66   :  { %2579 = vsyncadd [#allocation3], 4294966272 }
  0x67   :  { %2580 = dma.done.wait [#allocation6], 2048  }
  0x68   :  { %2581 = vsyncadd [#allocation6], 4294965248 }
  0x69   :  { %2582 = dma.done.wait [#allocation9], 2048  }
  0x6a   :  { %2583 = vsyncadd [#allocation9], 4294965248 }
  0x6b   :  { %2584 = dma.done.wait [#allocation12], 1024  }
  0x6c   :  { %2585 = vsyncadd [#allocation12], 4294966272  ;;  %v2360_v0 = vld [vmem:[#allocation5] sm:$0xff]   ;;  %v2361_v1 = vld [vmem:[#allocation5 + $0x8] sm:$0xff]   ;;  %v2596_v27 = vmov 0  }
  0x6d   :  { %2042 = vmatprep.subr.bf16.mxu0 %v2360_v0  ;;  %v2362_v2 = vld [vmem:[#allocation5 + $0x10] sm:$0xff]   ;;  %v2363_v3 = vld [vmem:[#allocation5 + $0x18] sm:$0xff]   ;;  %v2368_v4 = vld [vmem:[%s3221_s2] sm:$0xff]   ;;  %2358 = vset.pattern.permute.xlu0 %v2596_v27 }
  0x6e   :  { %2043 = vmatpush3.bf16.msra.mxu0 %v2360_v0  ;;  %2058 = vmatprep.mubr.bf16.mxu0 %v2368_v4  ;;  %v2364_v5 = vld [vmem:[#allocation5 + $0x20] sm:$0xff]   ;;  %v2365_v6 = vld [vmem:[#allocation5 + $0x28] sm:$0xff]   ;;  %v2366_v7 = vld [vmem:[#allocation5 + $0x30] sm:$0xff]  }
  0x6f   :  { %2044 = vmatprep.subr.bf16.mxu0 %v2361_v1  ;;  %v2367_v8 = vld [vmem:[#allocation5 + $0x38] sm:$0xff]   ;;  %v2369_v9 = vld [vmem:[%s3221_s2 + $0x8] sm:$0xff]   ;;  %v2370_v10 = vld [vmem:[%s3221_s2 + $0x10] sm:$0xff]   ;;  %2359 = vset.pattern.permute.xlu1 %v2596_v27 }
  0x70   :  { %v2371_v11 = vld [vmem:[%s3221_s2 + $0x18] sm:$0xff]   ;;  %v2372_v12 = vld [vmem:[%s3221_s2 + $0x20] sm:$0xff]   ;;  %v2373_v13 = vld [vmem:[%s3221_s2 + $0x28] sm:$0xff]  }
  0x71   :  { %v2374_v14 = vld [vmem:[%s3221_s2 + $0x30] sm:$0xff]   ;;  %v2375_v15 = vld [vmem:[%s3221_s2 + $0x38] sm:$0xff]   ;;  %v2376_v16 = vld [vmem:[#allocation2] sm:$0xff]  }
  0x72   :  { %2045 = vmatpush3.bf16.msra.mxu0 %v2361_v1  ;;  %v2377_v17 = vld [vmem:[#allocation2 + $0x8] sm:$0xff]   ;;  %v2378_v18 = vld [vmem:[#allocation2 + $0x10] sm:$0xff]   ;;  %v2379_v19 = vld [vmem:[#allocation2 + $0x18] sm:$0xff]  }
  0x73   :  { %2046 = vmatprep.subr.bf16.mxu0 %v2362_v2  ;;  %v2380_v20 = vld [vmem:[#allocation2 + $0x20] sm:$0xff]   ;;  %v2381_v21 = vld [vmem:[#allocation2 + $0x28] sm:$0xff]   ;;  %v2382_v22 = vld [vmem:[#allocation2 + $0x30] sm:$0xff]  }
  0x74   :  { %v2383_v23 = vld [vmem:[#allocation2 + $0x38] sm:$0xff]   ;;  %v2803_v24 = vld [vmem:[%s3219_s0] sm:$0xff]   ;;  %v143_v26 = vld [vmem:[%s3220_s1 + $0x10] sm:$0xff] }
  0x75   :  { %2090 = vmatprep.mubr.bf16.mxu1 %v2803_v24  ;;  %v141_v25 = vld [vmem:[%s3220_s1] sm:$0xff]  ;;  %564 = vperm.xlu1 %2359, %v143_v26   ;;  %v142_v28 = vld [vmem:[%s3220_s1 + $0x8] sm:$0xff]  ;;  %v144_v29 = vld [vmem:[%s3220_s1 + $0x18] sm:$0xff] }
  0x76   :  { %2047 = vmatpush3.bf16.msra.mxu0 %v2362_v2  ;;  %554 = vperm.xlu0 %2358, %v141_v25   ;;  %v145_v30 = vld [vmem:[%s3220_s1 + $0x20] sm:$0xff]  ;;  %v146_v31 = vld [vmem:[%s3220_s1 + $0x28] sm:$0xff]  ;;  %v147_v32 = vld [vmem:[%s3220_s1 + $0x30] sm:$0xff] }
  0x77   :  { %2048 = vmatprep.subr.bf16.mxu0 %v2363_v3  ;;  %v148_v33 = vld [vmem:[%s3220_s1 + $0x38] sm:$0xff]  ;;  %v149_v34 = vld [vmem:[%s3220_s1 + $0x40] sm:$0xff]  ;;  %v150_v35 = vld [vmem:[%s3220_s1 + $0x48] sm:$0xff] }
  0x78   :  { %v151_v36 = vld [vmem:[%s3220_s1 + $0x50] sm:$0xff]  ;;  %v152_v37 = vld [vmem:[%s3220_s1 + $0x58] sm:$0xff]  ;;  %v153_v38 = vld [vmem:[%s3220_s1 + $0x60] sm:$0xff] }
  0x79   :  { %569 = vperm.xlu1 %2359, %v144_v29   ;;  %v154_v39 = vld [vmem:[%s3220_s1 + $0x68] sm:$0xff]  ;;  %v155_v40 = vld [vmem:[%s3220_s1 + $0x70] sm:$0xff]  ;;  %v156_v41 = vld [vmem:[%s3220_s1 + $0x78] sm:$0xff] }
  0x7a   :  { %2049 = vmatpush3.bf16.msra.mxu0 %v2363_v3  ;;  %559 = vperm.xlu0 %2358, %v142_v28   ;;  %v2392_v2 = vld [vmem:[#allocation8] sm:$0xff]   ;;  %v2858_v3 = vld [vmem:[%s3219_s0 + $0x8] sm:$0xff]  }
  0x7b   :  { %2050 = vmatprep.subr.bf16.mxu0 %v2364_v5  ;;  %v2897_v26 = vld [vmem:[#allocation7] sm:$0xff]  }
  0x7d   :  { %579 = vperm.xlu1 %2359, %v146_v31  }
  0x7e   :  { %2051 = vmatpush3.bf16.msra.mxu0 %v2364_v5  ;;  %574 = vperm.xlu0 %2358, %v145_v30   ;;  %v2393_v5 = vld [vmem:[#allocation8 + $0x8] sm:$0xff]  }
  0x7f   :  { %2052 = vmatprep.subr.bf16.mxu0 %v2365_v6 }
  0x81   :  { %589 = vperm.xlu1 %2359, %v148_v33  }
  0x82   :  { %2053 = vmatpush3.bf16.msra.mxu0 %v2365_v6  ;;  %584 = vperm.xlu0 %2358, %v147_v32   ;;  %v2394_v6 = vld [vmem:[#allocation8 + $0x10] sm:$0xff]  }
  0x83   :  { %2054 = vmatprep.subr.bf16.mxu0 %v2366_v7 }
  0x85   :  { %599 = vperm.xlu1 %2359, %v150_v35  }
  0x86   :  { %2055 = vmatpush3.bf16.msra.mxu0 %v2366_v7  ;;  %594 = vperm.xlu0 %2358, %v149_v34   ;;  %v2870_v7 = vld [vmem:[%s3219_s0 + $0x18] sm:$0xff]  }
  0x87   :  { %2056 = vmatprep.subr.bf16.mxu0 %v2367_v8 }
  0x89   :  { %609 = vperm.xlu1 %2359, %v152_v37  }
  0x8a   :  { %2057 = vmatpush3.bf16.msra.mxu0 %v2367_v8  ;;  %604 = vperm.xlu0 %2358, %v151_v36   ;;  %v2875_v8 = vld [vmem:[%s3219_s0 + $0x20] sm:$0xff]  }
  0x8b   :  { %2106 = vmatprep.subr.bf16.mxu0 %v2376_v16 }
  0x8d   :  { %2059 = vmatmul.mubr.bf16.vlgmr.msra.gmra.mrb[0].mxu0 %v2369_v9  ;;  %619 = vperm.xlu1 %2359, %v154_v39  }
  0x8e   :  { %2062 = vmatprep.mubr.bf16.mxu0 %v2370_v10  ;;  %2107 = vmatpush3.bf16.msra.mxu0 %v2376_v16 }
  0x8f   :  { %2108 = vmatprep.subr.bf16.mxu0 %v2377_v17  ;;  %614 = vperm.xlu0 %2358, %v153_v38  }
  0x91   :  { %629 = vperm.xlu1 %2359, %v156_v41  }
  0x92   :  { %2109 = vmatpush3.bf16.msra.mxu0 %v2377_v17  ;;  %v2397_v17 = vld [vmem:[#allocation8 + $0x28] sm:$0xff]  }
  0x93   :  { %2110 = vmatprep.subr.bf16.mxu0 %v2378_v18  ;;  %624 = vperm.xlu0 %2358, %v155_v40  }
  0x95   :  { %2063 = vmatmul.mubr.bf16.gmra.mrb[4].mxu0 %v2371_v11 }
  0x96   :  { %2066 = vmatprep.mubr.bf16.mxu0 %v2372_v12  ;;  %2111 = vmatpush3.bf16.msra.mxu0 %v2378_v18 }
  0x97   :  { %2112 = vmatprep.subr.bf16.mxu0 %v2379_v19 }
  0x9a   :  { %2113 = vmatpush3.bf16.msra.mxu0 %v2379_v19  ;;  %v2398_v19 = vld [vmem:[#allocation8 + $0x30] sm:$0xff]  }
  0x9b   :  { %2114 = vmatprep.subr.bf16.mxu0 %v2380_v20 }
  0x9d   :  { %2067 = vmatmul.mubr.bf16.gmra.mrb[8].mxu0 %v2373_v13 }
  0x9e   :  { %2070 = vmatprep.mubr.bf16.mxu0 %v2374_v14  ;;  %2115 = vmatpush3.bf16.msra.mxu0 %v2380_v20 }
  0x9f   :  { %2116 = vmatprep.subr.bf16.mxu0 %v2381_v21 }
  0xa2   :  { %2117 = vmatpush3.bf16.msra.mxu0 %v2381_v21 }
  0xa3   :  { %2118 = vmatprep.subr.bf16.mxu0 %v2382_v22 }
  0xa5   :  { %2071 = vmatmul.mubr.bf16.gmra.mrb[12].mxu0 %v2375_v15 }
  0xa6   :  { %2122 = vmatprep.mubr.bf16.mxu0 %v2368_v4  ;;  %2119 = vmatpush3.bf16.msra.mxu0 %v2382_v22  ;;  %v2863_v4 = vld [vmem:[%s3219_s0 + $0x10] sm:$0xff]  }
  0xa7   :  { %2120 = vmatprep.subr.bf16.mxu0 %v2383_v23 }
  0xaa   :  { %2121 = vmatpush3.bf16.msra.mxu0 %v2383_v23  ;;  %v2399_v23 = vld [vmem:[#allocation8 + $0x38] sm:$0xff]  }
  0xad   :  { %2123 = vmatmul.mubr.bf16.vlgmr.msra.gmra.mrb[16].mxu0 %v2369_v9  ;;  %v2395_v9 = vld [vmem:[#allocation8 + $0x18] sm:$0xff]  }
  0xae   :  { %2126 = vmatprep.mubr.bf16.mxu0 %v2370_v10  ;;  %v2396_v10 = vld [vmem:[#allocation8 + $0x20] sm:$0xff]  }
  0xb5   :  { %2127 = vmatmul.mubr.bf16.gmra.mrb[20].mxu0 %v2371_v11  ;;  %v2882_v11 = vld [vmem:[%s3219_s0 + $0x28] sm:$0xff]  }
  0xb6   :  { %2130 = vmatprep.mubr.bf16.mxu0 %v2372_v12  ;;  %v2887_v12 = vld [vmem:[%s3219_s0 + $0x30] sm:$0xff]  }
  0xbd   :  { %2131 = vmatmul.mubr.bf16.gmra.mrb[24].mxu0 %v2373_v13  ;;  %v2894_v13 = vld [vmem:[%s3219_s0 + $0x38] sm:$0xff]  }
  0xbe   :  { %2134 = vmatprep.mubr.bf16.mxu0 %v2374_v14 }
  0xc5   :  { %2135 = vmatmul.mubr.bf16.gmra.mrb[28].mxu0 %v2375_v15 }
  0xc6   :  { %2186 = vmatprep.mubr.bf16.mxu0 %v2803_v24 }
  0xf4   :  { %v2918_v36 = vpop.permute.xlu1 %564 }
  0xf5   :  { %v2916_v35 = vpop.permute.xlu0 %554 }
  0xf8   :  { %v2922_v38 = vpop.permute.xlu1 %569 }
  0xf9   :  { %v2920_v37 = vpop.permute.xlu0 %559 }
  0xfc   :  { %v2926_v40 = vpop.permute.xlu1 %579 }
  0xfd   :  { %v2924_v39 = vpop.permute.xlu0 %574 }
 0x101   :  { %v2928_v41 = vpop.permute.xlu0 %584 }
 0x160   :  { %v2060_v42 = vpop.f32.mrb[0].mxu0 }
 0x161   :  { %v336_v43 = vpop.f32.mrb[1].mxu0 }
 0x162   :  { %v2061_v44 = vpop.f32.mrb[2].mxu0 }
 0x163   :  { %v400_v45 = vpack.c.bf16 %v2061_v44, %v2060_v42  ;;  %v339_v46 = vpop.f32.mrb[3].mxu0 }
 0x164   :  { %v399_v47 = vpack.c.bf16 %v339_v46, %v336_v43  ;;  %v2936_v46 = vld [vmem:[%s3224_s5] ss:$0 sm:$0xff] }
 0x166   :  { %2074 = vmatprep.subr.bf16.mxu1 %v399_v47 }
 0x167   :  { %2075 = vmatpush3.bf16.msra.mxu1 %v399_v47 }
 0x168   :  { %v2064_v48 = vpop.f32.mrb[4].mxu0  ;;  %2076 = vmatprep.subr.bf16.mxu1 %v400_v45 }
 0x169   :  { %v352_v49 = vpop.f32.mrb[5].mxu0 }
 0x16a   :  { %v2065_v50 = vpop.f32.mrb[6].mxu0 }
 0x16b   :  { %v402_v51 = vpack.c.bf16 %v2065_v50, %v2064_v48  ;;  %v355_v52 = vpop.f32.mrb[7].mxu0  ;;  %2077 = vmatpush3.bf16.msra.mxu1 %v400_v45  ;;  %v2931_v45 = vpop.permute.xlu1 %589 }
 0x16c   :  { %v401_v53 = vpack.c.bf16 %v355_v52, %v352_v49 }
 0x16e   :  { %2078 = vmatprep.subr.bf16.mxu1 %v401_v53 }
 0x16f   :  { %2079 = vmatpush3.bf16.msra.mxu1 %v401_v53 }
 0x170   :  { %v2068_v54 = vpop.f32.mrb[8].mxu0  ;;  %2080 = vmatprep.subr.bf16.mxu1 %v402_v51 }
 0x171   :  { %v368_v55 = vpop.f32.mrb[9].mxu0 }
 0x172   :  { %v2069_v56 = vpop.f32.mrb[10].mxu0 }
 0x173   :  { %v404_v57 = vpack.c.bf16 %v2069_v56, %v2068_v54  ;;  %v371_v58 = vpop.f32.mrb[11].mxu0  ;;  %2081 = vmatpush3.bf16.msra.mxu1 %v402_v51  ;;  %v2942_v56 = vpop.permute.xlu0 %594 }
 0x174   :  { %v403_v59 = vpack.c.bf16 %v371_v58, %v368_v55 }
 0x176   :  { %2082 = vmatprep.subr.bf16.mxu1 %v403_v59 }
 0x177   :  { %2083 = vmatpush3.bf16.msra.mxu1 %v403_v59 }
 0x178   :  { %v2072_v60 = vpop.f32.mrb[12].mxu0  ;;  %2084 = vmatprep.subr.bf16.mxu1 %v404_v57 }
 0x179   :  { %v384_v61 = vpop.f32.mrb[13].mxu0 }
 0x17a   :  { %v2073_v62 = vpop.f32.mrb[14].mxu0 }
 0x17b   :  { %v406_v63 = vpack.c.bf16 %v2073_v62, %v2072_v60  ;;  %v387_v0 = vpop.f32.mrb[15].mxu0  ;;  %2085 = vmatpush3.bf16.msra.mxu1 %v404_v57  ;;  %v2946_v60 = vpop.permute.xlu1 %599 }
 0x17c   :  { %v405_v1 = vpack.c.bf16 %v387_v0, %v384_v61 }
 0x17e   :  { %2086 = vmatprep.subr.bf16.mxu1 %v405_v1 }
 0x17f   :  { %2087 = vmatpush3.bf16.msra.mxu1 %v405_v1 }
 0x180   :  { %2088 = vmatprep.subr.bf16.mxu1 %v406_v63  ;;  %v2124_v14 = vpop.f32.mrb[16].mxu0 }
 0x181   :  { %v730_v15 = vpop.f32.mrb[17].mxu0 }
 0x182   :  { %v2125_v16 = vpop.f32.mrb[18].mxu0 }
 0x183   :  { %2089 = vmatpush3.bf16.msra.mxu1 %v406_v63  ;;  %v733_v18 = vpop.f32.mrb[19].mxu0 }
 0x184   :  { %2138 = vmatprep.subr.bf16.mxu1 %v2392_v2 }
 0x186   :  { %2091 = vmatmul.mubr.bf16.vlgmr.msra.gmra.mrb[0].mxu1 %v2858_v3 }
 0x187   :  { %2094 = vmatprep.mubr.bf16.mxu1 %v2863_v4  ;;  %2139 = vmatpush3.bf16.msra.mxu1 %v2392_v2 }
 0x188   :  { %2140 = vmatprep.subr.bf16.mxu1 %v2393_v5  ;;  %v2128_v20 = vpop.f32.mrb[20].mxu0 }
 0x189   :  { %v746_v21 = vpop.f32.mrb[21].mxu0 }
 0x18a   :  { %v2129_v22 = vpop.f32.mrb[22].mxu0 }
 0x18b   :  { %2141 = vmatpush3.bf16.msra.mxu1 %v2393_v5  ;;  %v749_v25 = vpop.f32.mrb[23].mxu0 }
 0x18c   :  { %2142 = vmatprep.subr.bf16.mxu1 %v2394_v6 }
 0x18e   :  { %2095 = vmatmul.mubr.bf16.gmra.mrb[4].mxu1 %v2870_v7 }
 0x18f   :  { %2098 = vmatprep.mubr.bf16.mxu1 %v2875_v8  ;;  %2143 = vmatpush3.bf16.msra.mxu1 %v2394_v6 }
 0x190   :  { %2144 = vmatprep.subr.bf16.mxu1 %v2395_v9  ;;  %v2899_v27 = vpop.f32.mrb[24].mxu0 }
 0x191   :  { %v2902_v28 = vpop.f32.mrb[25].mxu0 }
 0x192   :  { %v2904_v29 = vpop.f32.mrb[26].mxu0 }
 0x193   :  { %2145 = vmatpush3.bf16.msra.mxu1 %v2395_v9  ;;  %v2906_v30 = vpop.f32.mrb[27].mxu0 }
 0x194   :  { %2146 = vmatprep.subr.bf16.mxu1 %v2396_v10 }
 0x196   :  { %2099 = vmatmul.mubr.bf16.gmra.mrb[8].mxu1 %v2882_v11 }
 0x197   :  { %2102 = vmatprep.mubr.bf16.mxu1 %v2887_v12  ;;  %2147 = vmatpush3.bf16.msra.mxu1 %v2396_v10 }
 0x198   :  { %2148 = vmatprep.subr.bf16.mxu1 %v2397_v17  ;;  %v2908_v31 = vpop.f32.mrb[28].mxu0 }
 0x199   :  { %v2910_v32 = vpop.f32.mrb[29].mxu0 }
 0x19a   :  { %v2912_v33 = vpop.f32.mrb[30].mxu0 }
 0x19b   :  { %2149 = vmatpush3.bf16.msra.mxu1 %v2397_v17  ;;  %v2914_v34 = vpop.f32.mrb[31].mxu0 }
 0x19c   :  { %2150 = vmatprep.subr.bf16.mxu1 %v2398_v19 }
 0x19e   :  { %2103 = vmatmul.mubr.bf16.gmra.mrb[12].mxu1 %v2894_v13 }
 0x19f   :  { %2151 = vmatpush3.bf16.msra.mxu1 %v2398_v19 }
 0x1a0   :  { %2152 = vmatprep.subr.bf16.mxu1 %v2399_v23 }
 0x1a3   :  { %2153 = vmatpush3.bf16.msra.mxu1 %v2399_v23 }
 0x1a4   :  { %2202 = vmatprep.subr.bf16.mxu1 %v2897_v26 }
 0x259   :  { %v2092_v42 = vpop.f32.mrb[0].mxu1 }
 0x25a   :  { %v634_v43 = vmul.f32 %v2092_v42, %v2918_v36  ;;  %v489_v44 = vpop.f32.mrb[1].mxu1 }
 0x25b   :  { %v632_v47 = vmul.f32 %v2916_v35, %v489_v44  ;;  %v2093_v48 = vpop.f32.mrb[2].mxu1 }
 0x25c   :  { %v739_v49 = vadd.f32 %v2124_v14, %v634_v43  ;;  %v635_v50 = vmul.f32 %v2093_v48, %v2922_v38  ;;  %v492_v51 = vpop.f32.mrb[3].mxu1  ;;  %v2960_v48 = vpop.permute.xlu1 %609 }
 0x25d   :  { %v731_v52 = vadd.f32 %v730_v15, %v632_v47  ;;  %v633_v53 = vmul.f32 %v2920_v37, %v492_v51  ;;  %v2401_v47 = vld [vmem:[#allocation7 + $0x8] sm:$0xff]  }
 0x25e   :  { %v801_v54 = vadd.f32 %v2936_v46, %v739_v49  ;;  %v742_v55 = vadd.f32 %v2125_v16, %v635_v50 }
 0x25f   :  { %v799_v57 = vadd.f32 %v2936_v46, %v731_v52  ;;  %v734_v58 = vadd.f32 %v733_v18, %v633_v53  ;;  %v2954_v18 = vpop.permute.xlu0 %604 }
 0x260   :  { %v802_v59 = vadd.f32 %v2936_v46, %v742_v55  ;;  %v817_v63 = vmax.f32 %v801_v54, 0.0  ;;  %v2402_v55 = vld [vmem:[#allocation7 + $0x10] sm:$0xff]  }
 0x261   :  { %v800_v61 = vadd.f32 %v2936_v46, %v734_v58  ;;  %v2096_v62 = vpop.f32.mrb[4].mxu1  ;;  %v815_v5 = vmax.f32 %v799_v57, 0.0 }
 0x262   :  { %v818_v0 = vmax.f32 %v802_v59, 0.0  ;;  %v638_v1 = vmul.f32 %v2096_v62, %v2928_v41  ;;  %v505_v2 = vpop.f32.mrb[5].mxu1 }
 0x263   :  { %v816_v6 = vmax.f32 %v800_v61, 0.0  ;;  %v636_v9 = vmul.f32 %v2924_v39, %v505_v2  ;;  %v2097_v10 = vpop.f32.mrb[6].mxu1  ;;  %v2969_v57 = vpop.permute.xlu0 %614 }
 0x264   :  { %v2951_v14 = vpack.c.bf16 %v818_v0, %v817_v63  ;;  %v755_v15 = vadd.f32 %v2128_v20, %v638_v1  ;;  %v639_v16 = vmul.f32 %v2097_v10, %v2931_v45  ;;  %v508_v17 = vpop.f32.mrb[7].mxu1  ;;  %v2976_v1 = vpop.permute.xlu1 %619 }
 0x265   :  { %v747_v19 = vadd.f32 %v746_v21, %v636_v9  ;;  %v637_v23 = vmul.f32 %v2926_v40, %v508_v17  ;;  %v2957_v42 = vpack.c.bf16 %v816_v6, %v815_v5 }
 0x266   :  { %v805_v43 = vadd.f32 %v2936_v46, %v755_v15  ;;  %v758_v44 = vadd.f32 %v2129_v22, %v639_v16  ;;  %v2403_v15 = vld [vmem:[#allocation7 + $0x18] sm:$0xff]  }
 0x267   :  { %v803_v49 = vadd.f32 %v2936_v46, %v747_v19  ;;  %v750_v50 = vadd.f32 %v749_v25, %v637_v23  ;;  %2154 = vmatprep.mubr.bf16.mxu1 %v2957_v42 }
 0x268   :  { %v806_v20 = vadd.f32 %v2936_v46, %v758_v44  ;;  %2155 = vmatmul.mubr.bf16.vlgmr.msra.gmra.mrb[16].mxu1 %v2951_v14  ;;  %v821_v52 = vmax.f32 %v805_v43, 0.0 }
 0x269   :  { %v804_v21 = vadd.f32 %v2936_v46, %v750_v50  ;;  %v2100_v51 = vpop.f32.mrb[8].mxu1  ;;  %2203 = vmatpush3.bf16.msra.mxu1 %v2897_v26  ;;  %v819_v25 = vmax.f32 %v803_v49, 0.0  ;;  %v2404_v49 = vld [vmem:[#allocation7 + $0x20] sm:$0xff]   ;;  %v2990_v50 = vpop.permute.xlu1 %629 }
 0x26a   :  { %v822_v53 = vmax.f32 %v806_v20, 0.0  ;;  %v642_v22 = vmul.f32 %v2100_v51, %v2954_v18  ;;  %v521_v54 = vpop.f32.mrb[9].mxu1  ;;  %2204 = vmatprep.subr.bf16.mxu1 %v2401_v47 }
 0x26b   :  { %v820_v58 = vmax.f32 %v804_v21, 0.0  ;;  %v640_v59 = vmul.f32 %v2942_v56, %v521_v54  ;;  %v2101_v61 = vpop.f32.mrb[10].mxu1 }
 0x26c   :  { %v771_v62 = vadd.f32 %v2899_v27, %v642_v22  ;;  %v643_v63 = vmul.f32 %v2101_v61, %v2960_v48  ;;  %v524_v0 = vpop.f32.mrb[11].mxu1  ;;  %v2974_v26 = vpack.c.bf16 %v822_v53, %v821_v52 }
 0x26d   :  { %v763_v2 = vadd.f32 %v2902_v28, %v640_v59  ;;  %v641_v5 = vmul.f32 %v2946_v60, %v524_v0  ;;  %2205 = vmatpush3.bf16.msra.mxu1 %v2401_v47  ;;  %v833_v6 = vpack.c.bf16 %v820_v58, %v819_v25  ;;  %v2986_v28 = vpop.permute.xlu0 %624 }
 0x26e   :  { %v809_v9 = vadd.f32 %v2936_v46, %v771_v62  ;;  %v774_v10 = vadd.f32 %v2904_v29, %v643_v63  ;;  %2206 = vmatprep.subr.bf16.mxu1 %v2402_v55  ;;  %v2405_v62 = vld [vmem:[#allocation7 + $0x28] sm:$0xff]  }
 0x26f   :  { %v807_v27 = vadd.f32 %v2936_v46, %v763_v2  ;;  %v766_v16 = vadd.f32 %v2906_v30, %v641_v5  ;;  %2158 = vmatprep.mubr.bf16.mxu1 %v833_v6 }
 0x270   :  { %v810_v17 = vadd.f32 %v2936_v46, %v774_v10  ;;  %2159 = vmatmul.mubr.bf16.gmra.mrb[20].mxu1 %v2974_v26  ;;  %v825_v43 = vmax.f32 %v809_v9, 0.0  ;;  %v2406_v9 = vld [vmem:[#allocation7 + $0x30] sm:$0xff]  }
 0x271   :  { %v808_v19 = vadd.f32 %v2936_v46, %v766_v16  ;;  %v2104_v23 = vpop.f32.mrb[12].mxu1  ;;  %2207 = vmatpush3.bf16.msra.mxu1 %v2402_v55  ;;  %v823_v30 = vmax.f32 %v807_v27, 0.0  ;;  %v2407_v16 = vld [vmem:[#allocation7 + $0x38] sm:$0xff]  }
 0x272   :  { %v826_v44 = vmax.f32 %v810_v17, 0.0  ;;  %v646_v29 = vmul.f32 %v2104_v23, %v2986_v28  ;;  %v537_v47 = vpop.f32.mrb[13].mxu1  ;;  %2208 = vmatprep.subr.bf16.mxu1 %v2403_v15 }
 0x273   :  { %v824_v20 = vmax.f32 %v808_v19, 0.0  ;;  %v644_v21 = vmul.f32 %v2969_v57, %v537_v47  ;;  %v2105_v51 = vpop.f32.mrb[14].mxu1 }
 0x274   :  { %v787_v52 = vadd.f32 %v2908_v31, %v646_v29  ;;  %v647_v53 = vmul.f32 %v2105_v51, %v2990_v50  ;;  %v540_v22 = vpop.f32.mrb[15].mxu1  ;;  %v836_v54 = vpack.c.bf16 %v826_v44, %v825_v43 }
 0x275   :  { %v779_v55 = vadd.f32 %v2910_v32, %v644_v21  ;;  %v645_v25 = vmul.f32 %v2976_v1, %v540_v22  ;;  %2209 = vmatpush3.bf16.msra.mxu1 %v2403_v15  ;;  %v835_v58 = vpack.c.bf16 %v824_v20, %v823_v30 }
 0x276   :  { %v813_v59 = vadd.f32 %v2936_v46, %v787_v52  ;;  %v790_v61 = vadd.f32 %v2912_v33, %v647_v53  ;;  %2210 = vmatprep.subr.bf16.mxu1 %v2404_v49 }
 0x277   :  { %v811_v63 = vadd.f32 %v2936_v46, %v779_v55  ;;  %v782_v31 = vadd.f32 %v2914_v34, %v645_v25  ;;  %2162 = vmatprep.mubr.bf16.mxu1 %v835_v58 }
 0x278   :  { %v814_v0 = vadd.f32 %v2936_v46, %v790_v61  ;;  %2163 = vmatmul.mubr.bf16.gmra.mrb[24].mxu1 %v836_v54  ;;  %v829_v2 = vmax.f32 %v813_v59, 0.0 }
 0x279   :  { %v812_v32 = vadd.f32 %v2936_v46, %v782_v31  ;;  %2211 = vmatpush3.bf16.msra.mxu1 %v2404_v49  ;;  %v827_v10 = vmax.f32 %v811_v63, 0.0  ;;  %v2409_v63 = vld [vmem:[#allocation11 + $0x8] sm:$0xff]  }
 0x27a   :  { %v830_v5 = vmax.f32 %v814_v0, 0.0  ;;  %2212 = vmatprep.subr.bf16.mxu1 %v2405_v62  ;;  %v2410_v0 = vld [vmem:[#allocation11 + $0x10] sm:$0xff]  }
 0x27b   :  { %v828_v15 = vmax.f32 %v812_v32, 0.0 }
 0x27c   :  { %v838_v33 = vpack.c.bf16 %v830_v5, %v829_v2 }
 0x27d   :  { %2213 = vmatpush3.bf16.msra.mxu1 %v2405_v62  ;;  %v837_v27 = vpack.c.bf16 %v828_v15, %v827_v10  ;;  %v2412_v15 = vld [vmem:[#allocation11 + $0x20] sm:$0xff]  }
 0x27e   :  { %2214 = vmatprep.subr.bf16.mxu1 %v2406_v9 }
 0x27f   :  { %2166 = vmatprep.mubr.bf16.mxu1 %v837_v27 }
 0x280   :  { %2167 = vmatmul.mubr.bf16.gmra.mrb[28].mxu1 %v838_v33 }
 0x281   :  { %2215 = vmatpush3.bf16.msra.mxu1 %v2406_v9  ;;  %2218 = vmatprep.mubr.bf16.mxu1 %v2957_v42  ;;  %v2411_v9 = vld [vmem:[#allocation11 + $0x18] sm:$0xff]  }
 0x282   :  { %2216 = vmatprep.subr.bf16.mxu1 %v2407_v16 }
 0x285   :  { %2217 = vmatpush3.bf16.msra.mxu1 %v2407_v16 }
 0x288   :  { %2219 = vmatmul.mubr.bf16.vlgmr.msra.gmra.mrb[32].mxu1 %v2951_v14 }
 0x289   :  { %2222 = vmatprep.mubr.bf16.mxu1 %v833_v6 }
 0x290   :  { %2223 = vmatmul.mubr.bf16.gmra.mrb[36].mxu1 %v2974_v26 }
 0x291   :  { %2226 = vmatprep.mubr.bf16.mxu1 %v835_v58  ;;  %v2408_v58 = vld [vmem:[#allocation11] sm:$0xff]  }
 0x298   :  { %2227 = vmatmul.mubr.bf16.gmra.mrb[40].mxu1 %v836_v54 }
 0x299   :  { %2230 = vmatprep.mubr.bf16.mxu1 %v837_v27 }
 0x2a0   :  { %2231 = vmatmul.mubr.bf16.gmra.mrb[44].mxu1 %v838_v33 }
 0x2a1   :  { %2282 = vmatprep.mubr.bf16.mxu1 %v2803_v24 }
 0x33b   :  { %v2156_v34 = vpop.f32.mrb[16].mxu1 }
 0x33c   :  { %v954_v46 = vpop.f32.mrb[17].mxu1 }
 0x33d   :  { %v2157_v17 = vpop.f32.mrb[18].mxu1 }
 0x33e   :  { %v1018_v19 = vpack.c.bf16 %v2157_v17, %v2156_v34  ;;  %v957_v23 = vpop.f32.mrb[19].mxu1 }
 0x33f   :  { %v1017_v43 = vpack.c.bf16 %v957_v23, %v954_v46  ;;  %v2413_v23 = vld [vmem:[#allocation11 + $0x28] sm:$0xff]  }
 0x341   :  { %2170 = vmatprep.subr.bf16.mxu0 %v1017_v43 }
 0x342   :  { %2171 = vmatpush3.bf16.msra.mxu0 %v1017_v43  ;;  %v2414_v43 = vld [vmem:[#allocation11 + $0x30] sm:$0xff]  }
 0x343   :  { %v2160_v42 = vpop.f32.mrb[20].mxu1  ;;  %2172 = vmatprep.subr.bf16.mxu0 %v1018_v19 }
 0x344   :  { %v970_v14 = vpop.f32.mrb[21].mxu1 }
 0x345   :  { %v2161_v6 = vpop.f32.mrb[22].mxu1 }
 0x346   :  { %v1020_v44 = vpack.c.bf16 %v2161_v6, %v2160_v42  ;;  %v973_v26 = vpop.f32.mrb[23].mxu1  ;;  %2173 = vmatpush3.bf16.msra.mxu0 %v1018_v19  ;;  %v2415_v42 = vld [vmem:[#allocation11 + $0x38] sm:$0xff]  }
 0x347   :  { %v1019_v29 = vpack.c.bf16 %v973_v26, %v970_v14  ;;  %v3038_v14 = vld [vmem:[#allocation10] sm:$0xff]  }
 0x349   :  { %2174 = vmatprep.subr.bf16.mxu0 %v1019_v29 }
 0x34a   :  { %2175 = vmatpush3.bf16.msra.mxu0 %v1019_v29  ;;  %v3045_v29 = vld [vmem:[%s3227_s8] ss:$0 sm:$0xff] }
 0x34b   :  { %v2164_v47 = vpop.f32.mrb[24].mxu1  ;;  %2176 = vmatprep.subr.bf16.mxu0 %v1020_v44 }
 0x34c   :  { %v986_v24 = vpop.f32.mrb[25].mxu1 }
 0x34d   :  { %v2165_v49 = vpop.f32.mrb[26].mxu1 }
 0x34e   :  { %v1022_v30 = vpack.c.bf16 %v2165_v49, %v2164_v47  ;;  %v989_v20 = vpop.f32.mrb[27].mxu1  ;;  %2177 = vmatpush3.bf16.msra.mxu0 %v1020_v44 }
 0x34f   :  { %v1021_v21 = vpack.c.bf16 %v989_v20, %v986_v24 }
 0x351   :  { %2178 = vmatprep.subr.bf16.mxu0 %v1021_v21 }
 0x352   :  { %2179 = vmatpush3.bf16.msra.mxu0 %v1021_v21 }
 0x353   :  { %v2168_v51 = vpop.f32.mrb[28].mxu1  ;;  %2180 = vmatprep.subr.bf16.mxu0 %v1022_v30 }
 0x354   :  { %v1002_v52 = vpop.f32.mrb[29].mxu1 }
 0x355   :  { %v2169_v53 = vpop.f32.mrb[30].mxu1 }
 0x356   :  { %v1024_v22 = vpack.c.bf16 %v2169_v53, %v2168_v51  ;;  %v1005_v54 = vpop.f32.mrb[31].mxu1  ;;  %2181 = vmatpush3.bf16.msra.mxu0 %v1022_v30 }
 0x357   :  { %v1023_v55 = vpack.c.bf16 %v1005_v54, %v1002_v52 }
 0x359   :  { %2182 = vmatprep.subr.bf16.mxu0 %v1023_v55 }
 0x35a   :  { %2183 = vmatpush3.bf16.msra.mxu0 %v1023_v55 }
 0x35b   :  { %2184 = vmatprep.subr.bf16.mxu0 %v1024_v22  ;;  %v2220_v25 = vpop.f32.mrb[32].mxu1 }
 0x35c   :  { %v1220_v59 = vpop.f32.mrb[33].mxu1 }
 0x35d   :  { %v2221_v61 = vpop.f32.mrb[34].mxu1 }
 0x35e   :  { %2185 = vmatpush3.bf16.msra.mxu0 %v1024_v22  ;;  %v1223_v62 = vpop.f32.mrb[35].mxu1 }
 0x35f   :  { %2234 = vmatprep.subr.bf16.mxu0 %v2408_v58 }
 0x361   :  { %2187 = vmatmul.mubr.bf16.vlgmr.msra.gmra.mrb[32].mxu0 %v2858_v3 }
 0x362   :  { %2190 = vmatprep.mubr.bf16.mxu0 %v2863_v4  ;;  %2235 = vmatpush3.bf16.msra.mxu0 %v2408_v58 }
 0x363   :  { %v3009_v31 = vpop.f32.mrb[36].mxu1  ;;  %2236 = vmatprep.subr.bf16.mxu0 %v2409_v63 }
 0x364   :  { %v3011_v32 = vpop.f32.mrb[37].mxu1 }
 0x365   :  { %v3013_v2 = vpop.f32.mrb[38].mxu1 }
 0x366   :  { %v3015_v5 = vpop.f32.mrb[39].mxu1  ;;  %2237 = vmatpush3.bf16.msra.mxu0 %v2409_v63 }
 0x367   :  { %2238 = vmatprep.subr.bf16.mxu0 %v2410_v0 }
 0x369   :  { %2191 = vmatmul.mubr.bf16.gmra.mrb[36].mxu0 %v2870_v7 }
 0x36a   :  { %2194 = vmatprep.mubr.bf16.mxu0 %v2875_v8  ;;  %2239 = vmatpush3.bf16.msra.mxu0 %v2410_v0 }
 0x36b   :  { %v3019_v10 = vpop.f32.mrb[40].mxu1  ;;  %2240 = vmatprep.subr.bf16.mxu0 %v2411_v9 }
 0x36c   :  { %v3021_v33 = vpop.f32.mrb[41].mxu1 }
 0x36d   :  { %v3023_v27 = vpop.f32.mrb[42].mxu1 }
 0x36e   :  { %v3025_v16 = vpop.f32.mrb[43].mxu1  ;;  %2241 = vmatpush3.bf16.msra.mxu0 %v2411_v9 }
 0x36f   :  { %2242 = vmatprep.subr.bf16.mxu0 %v2412_v15 }
 0x371   :  { %2195 = vmatmul.mubr.bf16.gmra.mrb[40].mxu0 %v2882_v11 }
 0x372   :  { %2198 = vmatprep.mubr.bf16.mxu0 %v2887_v12  ;;  %2243 = vmatpush3.bf16.msra.mxu0 %v2412_v15 }
 0x373   :  { %v3029_v34 = vpop.f32.mrb[44].mxu1  ;;  %2244 = vmatprep.subr.bf16.mxu0 %v2413_v23 }
 0x374   :  { %v3031_v46 = vpop.f32.mrb[45].mxu1 }
 0x375   :  { %v3033_v17 = vpop.f32.mrb[46].mxu1 }
 0x376   :  { %v3035_v19 = vpop.f32.mrb[47].mxu1  ;;  %2245 = vmatpush3.bf16.msra.mxu0 %v2413_v23 }
 0x377   :  { %2246 = vmatprep.subr.bf16.mxu0 %v2414_v43 }
 0x379   :  { %2199 = vmatmul.mubr.bf16.gmra.mrb[44].mxu0 %v2894_v13 }
 0x37a   :  { %2247 = vmatpush3.bf16.msra.mxu0 %v2414_v43 }
 0x37b   :  { %2248 = vmatprep.subr.bf16.mxu0 %v2415_v42 }
 0x37e   :  { %2249 = vmatpush3.bf16.msra.mxu0 %v2415_v42 }
 0x37f   :  { %2298 = vmatprep.subr.bf16.mxu0 %v3038_v14 }
 0x434   :  { %v2188_v6 = vpop.f32.mrb[32].mxu0 }
 0x435   :  { %v1124_v44 = vmul.f32 %v2188_v6, %v2918_v36  ;;  %v1059_v26 = vpop.f32.mrb[33].mxu0 }
 0x436   :  { %v1122_v47 = vmul.f32 %v1059_v26, %v2916_v35  ;;  %v2189_v24 = vpop.f32.mrb[34].mxu0 }
 0x437   :  { %v1229_v49 = vadd.f32 %v2220_v25, %v1124_v44  ;;  %v1125_v30 = vmul.f32 %v2189_v24, %v2922_v38  ;;  %v1062_v20 = vpop.f32.mrb[35].mxu0 }
 0x438   :  { %v1221_v21 = vadd.f32 %v1220_v59, %v1122_v47  ;;  %v1123_v51 = vmul.f32 %v1062_v20, %v2920_v37  ;;  %v3066_v20 = vld [vmem:[#allocation10 + $0x8] sm:$0xff]  }
 0x439   :  { %v1291_v52 = vadd.f32 %v3045_v29, %v1229_v49  ;;  %v1232_v53 = vadd.f32 %v2221_v61, %v1125_v30 }
 0x43a   :  { %v1289_v22 = vadd.f32 %v3045_v29, %v1221_v21  ;;  %v1224_v54 = vadd.f32 %v1223_v62, %v1123_v51 }
 0x43b   :  { %v1292_v55 = vadd.f32 %v3045_v29, %v1232_v53  ;;  %v1307_v0 = vmax.f32 %v1291_v52, 0.0 }
 0x43c   :  { %v1290_v58 = vadd.f32 %v3045_v29, %v1224_v54  ;;  %v2192_v63 = vpop.f32.mrb[36].mxu0  ;;  %v1305_v23 = vmax.f32 %v1289_v22, 0.0 }
 0x43d   :  { %v1308_v9 = vmax.f32 %v1292_v55, 0.0  ;;  %v1128_v25 = vmul.f32 %v2192_v63, %v2928_v41  ;;  %v1075_v15 = vpop.f32.mrb[37].mxu0  ;;  %v3077_v55 = vld [vmem:[#allocation10 + $0x10] sm:$0xff]  }
 0x43e   :  { %v1306_v59 = vmax.f32 %v1290_v58, 0.0  ;;  %v1126_v43 = vmul.f32 %v1075_v15, %v2924_v39  ;;  %v2193_v42 = vpop.f32.mrb[38].mxu0 }
 0x43f   :  { %v3056_v6 = vpack.c.bf16 %v1308_v9, %v1307_v0  ;;  %v1245_v61 = vadd.f32 %v3009_v31, %v1128_v25  ;;  %v1129_v62 = vmul.f32 %v2193_v42, %v2931_v45  ;;  %v1078_v44 = vpop.f32.mrb[39].mxu0 }
 0x440   :  { %v1237_v26 = vadd.f32 %v3011_v32, %v1126_v43  ;;  %v1127_v47 = vmul.f32 %v1078_v44, %v2926_v40  ;;  %v3062_v24 = vpack.c.bf16 %v1306_v59, %v1305_v23  ;;  %v3090_v44 = vld [vmem:[#allocation10 + $0x18] sm:$0xff]  }
 0x441   :  { %v1295_v49 = vadd.f32 %v3045_v29, %v1245_v61  ;;  %v1248_v30 = vadd.f32 %v3013_v2, %v1129_v62 }
 0x442   :  { %v1293_v21 = vadd.f32 %v3045_v29, %v1237_v26  ;;  %v1240_v51 = vadd.f32 %v3015_v5, %v1127_v47  ;;  %2250 = vmatprep.mubr.bf16.mxu0 %v3062_v24 }
 0x443   :  { %v1296_v31 = vadd.f32 %v3045_v29, %v1248_v30  ;;  %2251 = vmatmul.mubr.bf16.vlgmr.msra.gmra.mrb[48].mxu0 %v3056_v6  ;;  %v1311_v53 = vmax.f32 %v1295_v49, 0.0 }
 0x444   :  { %v1294_v32 = vadd.f32 %v3045_v29, %v1240_v51  ;;  %v2196_v52 = vpop.f32.mrb[40].mxu0  ;;  %2299 = vmatpush3.bf16.msra.mxu0 %v3038_v14  ;;  %v1309_v5 = vmax.f32 %v1293_v21, 0.0 }
 0x445   :  { %v1312_v22 = vmax.f32 %v1296_v31, 0.0  ;;  %v1132_v2 = vmul.f32 %v2196_v52, %v2954_v18  ;;  %v1091_v54 = vpop.f32.mrb[41].mxu0  ;;  %2300 = vmatprep.subr.bf16.mxu0 %v3066_v20  ;;  %v3100_v31 = vld [vmem:[#allocation10 + $0x20] sm:$0xff]  }
 0x446   :  { %v1310_v58 = vmax.f32 %v1294_v32, 0.0  ;;  %v1130_v63 = vmul.f32 %v1091_v54, %v2942_v56  ;;  %v2197_v0 = vpop.f32.mrb[42].mxu0 }
 0x447   :  { %v1261_v9 = vadd.f32 %v3019_v10, %v1132_v2  ;;  %v1133_v25 = vmul.f32 %v2197_v0, %v2960_v48  ;;  %v1094_v15 = vpop.f32.mrb[43].mxu0  ;;  %v3082_v23 = vpack.c.bf16 %v1312_v22, %v1311_v53 }
 0x448   :  { %v1253_v59 = vadd.f32 %v3021_v33, %v1130_v63  ;;  %v1131_v43 = vmul.f32 %v1094_v15, %v2946_v60  ;;  %2301 = vmatpush3.bf16.msra.mxu0 %v3066_v20  ;;  %v1323_v42 = vpack.c.bf16 %v1310_v58, %v1309_v5 }
 0x449   :  { %v1299_v61 = vadd.f32 %v3045_v29, %v1261_v9  ;;  %v1264_v62 = vadd.f32 %v3023_v27, %v1133_v25  ;;  %2302 = vmatprep.subr.bf16.mxu0 %v3077_v55 }
 0x44a   :  { %v1297_v10 = vadd.f32 %v3045_v29, %v1253_v59  ;;  %v1256_v26 = vadd.f32 %v3025_v16, %v1131_v43  ;;  %2254 = vmatprep.mubr.bf16.mxu0 %v1323_v42 }
 0x44b   :  { %v1300_v33 = vadd.f32 %v3045_v29, %v1264_v62  ;;  %2255 = vmatmul.mubr.bf16.gmra.mrb[52].mxu0 %v3082_v23  ;;  %v1315_v30 = vmax.f32 %v1299_v61, 0.0  ;;  %v3125_v62 = vld [vmem:[#allocation10 + $0x30] sm:$0xff]  }
 0x44c   :  { %v1298_v47 = vadd.f32 %v3045_v29, %v1256_v26  ;;  %v2200_v49 = vpop.f32.mrb[44].mxu0  ;;  %2303 = vmatpush3.bf16.msra.mxu0 %v3077_v55  ;;  %v1313_v16 = vmax.f32 %v1297_v10, 0.0 }
 0x44d   :  { %v1316_v27 = vmax.f32 %v1300_v33, 0.0  ;;  %v1136_v21 = vmul.f32 %v2200_v49, %v2986_v28  ;;  %v1107_v51 = vpop.f32.mrb[45].mxu0  ;;  %2304 = vmatprep.subr.bf16.mxu0 %v3090_v44 }
 0x44e   :  { %v1314_v32 = vmax.f32 %v1298_v47, 0.0  ;;  %v1134_v52 = vmul.f32 %v1107_v51, %v2969_v57  ;;  %v2201_v53 = vpop.f32.mrb[46].mxu0  ;;  %v3133_v47 = vld [vmem:[#allocation10 + $0x38] sm:$0xff]  }
 0x44f   :  { %v1277_v22 = vadd.f32 %v3029_v34, %v1136_v21  ;;  %v1137_v2 = vmul.f32 %v2201_v53, %v2990_v50  ;;  %v1110_v54 = vpop.f32.mrb[47].mxu0  ;;  %v3105_v5 = vpack.c.bf16 %v1316_v27, %v1315_v30  ;;  %v3115_v34 = vld [vmem:[#allocation10 + $0x28] sm:$0xff]  }
 0x450   :  { %v1269_v58 = vadd.f32 %v3031_v46, %v1134_v52  ;;  %v1135_v63 = vmul.f32 %v1110_v54, %v2976_v1  ;;  %2305 = vmatpush3.bf16.msra.mxu0 %v3090_v44  ;;  %v3110_v0 = vpack.c.bf16 %v1314_v32, %v1313_v16 }
 0x451   :  { %v1303_v9 = vadd.f32 %v3045_v29, %v1277_v22  ;;  %v1280_v25 = vadd.f32 %v3033_v17, %v1137_v2  ;;  %2306 = vmatprep.subr.bf16.mxu0 %v3100_v31 }
 0x452   :  { %v1301_v15 = vadd.f32 %v3045_v29, %v1269_v58  ;;  %v1272_v59 = vadd.f32 %v3035_v19, %v1135_v63  ;;  %2258 = vmatprep.mubr.bf16.mxu0 %v3110_v0 }
 0x453   :  { %v1304_v46 = vadd.f32 %v3045_v29, %v1280_v25  ;;  %2259 = vmatmul.mubr.bf16.gmra.mrb[56].mxu0 %v3105_v5  ;;  %v1319_v61 = vmax.f32 %v1303_v9, 0.0 }
 0x454   :  { %v1302_v43 = vadd.f32 %v3045_v29, %v1272_v59  ;;  %2307 = vmatpush3.bf16.msra.mxu0 %v3100_v31  ;;  %v1317_v10 = vmax.f32 %v1301_v15, 0.0 }
 0x455   :  { %v1320_v17 = vmax.f32 %v1304_v46, 0.0  ;;  %2308 = vmatprep.subr.bf16.mxu0 %v3115_v34 }
 0x456   :  { %v1318_v26 = vmax.f32 %v1302_v43, 0.0 }
 0x457   :  { %v3127_v33 = vpack.c.bf16 %v1320_v17, %v1319_v61 }
 0x458   :  { %2309 = vmatpush3.bf16.msra.mxu0 %v3115_v34  ;;  %v3130_v19 = vpack.c.bf16 %v1318_v26, %v1317_v10 }
 0x459   :  { %2310 = vmatprep.subr.bf16.mxu0 %v3125_v62 }
 0x45a   :  { %2262 = vmatprep.mubr.bf16.mxu0 %v3130_v19 }
 0x45b   :  { %2263 = vmatmul.mubr.bf16.gmra.mrb[60].mxu0 %v3127_v33 }
 0x45c   :  { %2311 = vmatpush3.bf16.msra.mxu0 %v3125_v62  ;;  %2314 = vmatprep.mubr.bf16.mxu0 %v3062_v24 }
 0x45d   :  { %2312 = vmatprep.subr.bf16.mxu0 %v3133_v47 }
 0x460   :  { %2313 = vmatpush3.bf16.msra.mxu0 %v3133_v47 }
 0x463   :  { %2315 = vmatmul.mubr.bf16.vlgmr.msra.gmra.mrb[64].mxu0 %v3056_v6 }
 0x464   :  { %2318 = vmatprep.mubr.bf16.mxu0 %v1323_v42 }
 0x46b   :  { %2319 = vmatmul.mubr.bf16.gmra.mrb[68].mxu0 %v3082_v23 }
 0x516   :  { %v2252_v29 = vpop.f32.mrb[48].mxu0 }
 0x517   :  { %v1444_v49 = vpop.f32.mrb[49].mxu0 }
 0x518   :  { %v2253_v30 = vpop.f32.mrb[50].mxu0 }
 0x519   :  { %v1508_v27 = vpack.c.bf16 %v2253_v30, %v2252_v29  ;;  %v1447_v21 = vpop.f32.mrb[51].mxu0 }
 0x51a   :  { %v1507_v51 = vpack.c.bf16 %v1447_v21, %v1444_v49 }
 0x51c   :  { %2266 = vmatprep.subr.bf16.mxu1 %v1507_v51 }
 0x51d   :  { %2267 = vmatpush3.bf16.msra.mxu1 %v1507_v51 }
 0x51e   :  { %v2256_v16 = vpop.f32.mrb[52].mxu0  ;;  %2268 = vmatprep.subr.bf16.mxu1 %v1508_v27 }
 0x51f   :  { %v1460_v24 = vpop.f32.mrb[53].mxu0 }
 0x520   :  { %v2257_v32 = vpop.f32.mrb[54].mxu0 }
 0x521   :  { %v1510_v52 = vpack.c.bf16 %v2257_v32, %v2256_v16  ;;  %v1463_v53 = vpop.f32.mrb[55].mxu0  ;;  %2269 = vmatpush3.bf16.msra.mxu1 %v1508_v27 }
 0x522   :  { %v1509_v22 = vpack.c.bf16 %v1463_v53, %v1460_v24 }
 0x524   :  { %2270 = vmatprep.subr.bf16.mxu1 %v1509_v22 }
 0x525   :  { %2271 = vmatpush3.bf16.msra.mxu1 %v1509_v22 }
 0x526   :  { %v2260_v6 = vpop.f32.mrb[56].mxu0  ;;  %2272 = vmatprep.subr.bf16.mxu1 %v1510_v52 }
 0x527   :  { %v1476_v23 = vpop.f32.mrb[57].mxu0 }
 0x528   :  { %v2261_v42 = vpop.f32.mrb[58].mxu0 }
 0x529   :  { %v1512_v2 = vpack.c.bf16 %v2261_v42, %v2260_v6  ;;  %v1479_v54 = vpop.f32.mrb[59].mxu0  ;;  %2273 = vmatpush3.bf16.msra.mxu1 %v1510_v52 }
 0x52a   :  { %v1511_v58 = vpack.c.bf16 %v1479_v54, %v1476_v23 }
 0x52c   :  { %2274 = vmatprep.subr.bf16.mxu1 %v1511_v58 }
 0x52d   :  { %2275 = vmatpush3.bf16.msra.mxu1 %v1511_v58 }
 0x52e   :  { %v2264_v63 = vpop.f32.mrb[60].mxu0  ;;  %2276 = vmatprep.subr.bf16.mxu1 %v1512_v2 }
 0x52f   :  { %v1492_v9 = vpop.f32.mrb[61].mxu0 }
 0x530   :  { %v2265_v25 = vpop.f32.mrb[62].mxu0 }
 0x531   :  { %v1514_v15 = vpack.c.bf16 %v2265_v25, %v2264_v63  ;;  %v1495_v59 = vpop.f32.mrb[63].mxu0  ;;  %2277 = vmatpush3.bf16.msra.mxu1 %v1512_v2 }
 0x532   :  { %v1513_v46 = vpack.c.bf16 %v1495_v59, %v1492_v9 }
 0x534   :  { %2278 = vmatprep.subr.bf16.mxu1 %v1513_v46 }
 0x535   :  { %2279 = vmatpush3.bf16.msra.mxu1 %v1513_v46 }
 0x536   :  { %2280 = vmatprep.subr.bf16.mxu1 %v1514_v15  ;;  %v2316_v43 = vpop.f32.mrb[64].mxu0 }
 0x537   :  { %v1710_v61 = vpop.f32.mrb[65].mxu0 }
 0x538   :  { %v2317_v17 = vpop.f32.mrb[66].mxu0 }
 0x539   :  { %2281 = vmatpush3.bf16.msra.mxu1 %v1514_v15  ;;  %v1713_v10 = vpop.f32.mrb[67].mxu0 }
 0x53a   :  { %2330 = vmatprep.subr.bf16.mxu1 %v3038_v14 }
 0x53c   :  { %2283 = vmatmul.mubr.bf16.vlgmr.msra.gmra.mrb[48].mxu1 %v2858_v3 }
 0x53d   :  { %2338 = vmatpush3.bf16.msra.mxu1 %v3038_v14  ;;  %2286 = vmatprep.mubr.bf16.mxu1 %v2863_v4 }
 0x53e   :  { %v2320_v26 = vpop.f32.mrb[68].mxu0  ;;  %2331 = vmatprep.subr.bf16.mxu1 %v3066_v20 }
 0x53f   :  { %v1726_v29 = vpop.f32.mrb[69].mxu0 }
 0x540   :  { %v2321_v49 = vpop.f32.mrb[70].mxu0 }
 0x541   :  { %2339 = vmatpush3.bf16.msra.mxu1 %v3066_v20  ;;  %v1729_v30 = vpop.f32.mrb[71].mxu0 }
 0x542   :  { %2332 = vmatprep.subr.bf16.mxu1 %v3077_v55 }
 0x544   :  { %2287 = vmatmul.mubr.bf16.gmra.mrb[52].mxu1 %v2870_v7 }
 0x545   :  { %2340 = vmatpush3.bf16.msra.mxu1 %v3077_v55  ;;  %2290 = vmatprep.mubr.bf16.mxu1 %v2875_v8  ;;  %v3174_v8 = vld [vmem:[%s3230_s11] ss:$0 sm:$0xff]  ;;  %s2597_s11 = smov [#allocation13]  }
 0x546   :  { %2333 = vmatprep.subr.bf16.mxu1 %v3090_v44  ;;  %s1816_s2 = sshll.u32 %s2597_s11, 4  ;;  %s1817_s2 = int_to_ptr.vmem [resolvable:$true] %s1816_s2 }
 0x547   :  { %s2556_s17 = scalar_lea.vmem %s1817_s2, 2048  ;;  %p2561_p7 = scmp.lt.s32.totalorder %s1817_s2, %s1817_s2 }
 0x548   :  { %p2557_p6 = scmp.ne.s32.totalorder %s1817_s2, %s2556_s17  ;;  %p2562_p8 = scmp.lt.s32.totalorder %s2556_s17, %s2556_s17 }
 0x549   :  { %2341 = vmatpush3.bf16.msra.mxu1 %v3090_v44 }
 0x54a   :  { %2334 = vmatprep.subr.bf16.mxu1 %v3100_v31  ;;  %p2563_p9 = por %p2562_p8, %p2561_p7 }
 0x54c   :  { %2291 = vmatmul.mubr.bf16.gmra.mrb[56].mxu1 %v2882_v11  ;;  %p2564_p10 = pnand %p2563_p9, %p2557_p6 }
 0x54d   :  { %2342 = vmatpush3.bf16.msra.mxu1 %v3100_v31  ;;  %2294 = vmatprep.mubr.bf16.mxu1 %v2887_v12 }
 0x54e   :  { %2335 = vmatprep.subr.bf16.mxu1 %v3115_v34 }
 0x551   :  { %2343 = vmatpush3.bf16.msra.mxu1 %v3115_v34 }
 0x552   :  { %2336 = vmatprep.subr.bf16.mxu1 %v3125_v62 }
 0x554   :  { %2295 = vmatmul.mubr.bf16.gmra.mrb[60].mxu1 %v2894_v13 }
 0x555   :  { %2344 = vmatpush3.bf16.msra.mxu1 %v3125_v62  ;;  %2322 = vmatprep.mubr.bf16.mxu1 %v3110_v0 }
 0x556   :  { %2337 = vmatprep.subr.bf16.mxu1 %v3133_v47 }
 0x559   :  { %2345 = vmatpush3.bf16.msra.mxu1 %v3133_v47 }
 0x55c   :  { %2323 = vmatmul.mubr.bf16.vlgmr.msra.gmra.mrb[64].mxu1 %v3105_v5 }
 0x55d   :  { %2326 = vmatprep.mubr.bf16.mxu1 %v3130_v19 }
 0x564   :  { %2327 = vmatmul.mubr.bf16.gmra.mrb[68].mxu1 %v3127_v33 }
 0x60f   :  { %v2284_v3 = vpop.f32.mrb[48].mxu1 }
 0x610   :  { %v1614_v4 = vmul.f32 %v2284_v3, %v2918_v36  ;;  %v1549_v7 = vpop.f32.mrb[49].mxu1 }
 0x611   :  { %v1612_v11 = vmul.f32 %v1549_v7, %v2916_v35  ;;  %v2285_v12 = vpop.f32.mrb[50].mxu1 }
 0x612   :  { %v1719_v13 = vadd.f32 %v2316_v43, %v1614_v4  ;;  %v1615_v14 = vmul.f32 %v2285_v12, %v2922_v38  ;;  %v1552_v20 = vpop.f32.mrb[51].mxu1 }
 0x613   :  { %v1711_v55 = vadd.f32 %v1710_v61, %v1612_v11  ;;  %v1613_v44 = vmul.f32 %v1552_v20, %v2920_v37 }
 0x614   :  { %v1781_v31 = vadd.f32 %v3174_v8, %v1719_v13  ;;  %v1722_v5 = vadd.f32 %v2317_v17, %v1615_v14 }
 0x615   :  { %v1779_v36 = vadd.f32 %v3174_v8, %v1711_v55  ;;  %v1714_v0 = vadd.f32 %v1713_v10, %v1613_v44 }
 0x616   :  { %1797 = vst [vmem:[#allocation13 + $0x10] sm:$0xff] %v1781_v31  ;;  %v1782_v34 = vadd.f32 %v3174_v8, %v1722_v5 }
 0x617   :  { %1795 = vst [vmem:[#allocation13] sm:$0xff] %v1779_v36  ;;  %v1780_v35 = vadd.f32 %v3174_v8, %v1714_v0  ;;  %v2288_v62 = vpop.f32.mrb[52].mxu1 }
 0x618   :  { %1798 = vst [vmem:[#allocation13 + $0x18] sm:$0xff] %v1782_v34  ;;  %v1618_v38 = vmul.f32 %v2288_v62, %v2928_v41  ;;  %v1565_v33 = vpop.f32.mrb[53].mxu1 }
 0x619   :  { %1796 = vst [vmem:[#allocation13 + $0x8] sm:$0xff] %v1780_v35  ;;  %v1616_v37 = vmul.f32 %v1565_v33, %v2924_v39  ;;  %v2289_v19 = vpop.f32.mrb[54].mxu1 }
 0x61a   :  { %v1735_v47 = vadd.f32 %v2320_v26, %v1618_v38  ;;  %v1619_v27 = vmul.f32 %v2289_v19, %v2931_v45  ;;  %v1568_v21 = vpop.f32.mrb[55].mxu1 }
 0x61b   :  { %v1727_v51 = vadd.f32 %v1726_v29, %v1616_v37  ;;  %v1617_v16 = vmul.f32 %v1568_v21, %v2926_v40 }
 0x61c   :  { %v1785_v24 = vadd.f32 %v3174_v8, %v1735_v47  ;;  %v1738_v32 = vadd.f32 %v2321_v49, %v1619_v27 }
 0x61d   :  { %v1783_v52 = vadd.f32 %v3174_v8, %v1727_v51  ;;  %v1730_v53 = vadd.f32 %v1729_v30, %v1617_v16 }
 0x61e   :  { %1801 = vst [vmem:[#allocation13 + $0x30] sm:$0xff] %v1785_v24  ;;  %v1786_v41 = vadd.f32 %v3174_v8, %v1738_v32 }
 0x61f   :  { %1799 = vst [vmem:[#allocation13 + $0x20] sm:$0xff] %v1783_v52  ;;  %v1784_v39 = vadd.f32 %v3174_v8, %v1730_v53  ;;  %v2292_v22 = vpop.f32.mrb[56].mxu1 }
 0x620   :  { %1802 = vst [vmem:[#allocation13 + $0x38] sm:$0xff] %v1786_v41  ;;  %v1581_v6 = vpop.f32.mrb[57].mxu1  ;;  %v1622_v58 = vmul.f32 %v2292_v22, %v2954_v18 }
 0x621   :  { %1800 = vst [vmem:[#allocation13 + $0x28] sm:$0xff] %v1784_v39  ;;  %v2293_v45 = vpop.f32.mrb[58].mxu1  ;;  %v1620_v63 = vmul.f32 %v1581_v6, %v2942_v56 }
 0x622   :  { %v1584_v23 = vpop.f32.mrb[59].mxu1  ;;  %v1623_v25 = vmul.f32 %v2293_v45, %v2960_v48 }
 0x623   :  { %v1621_v46 = vmul.f32 %v1584_v23, %v2946_v60 }
 0x627   :  { %v2296_v42 = vpop.f32.mrb[60].mxu1 }
 0x628   :  { %v1597_v40 = vpop.f32.mrb[61].mxu1  ;;  %v1626_v48 = vmul.f32 %v2296_v42, %v2986_v28 }
 0x629   :  { %v2297_v2 = vpop.f32.mrb[62].mxu1  ;;  %v1624_v60 = vmul.f32 %v1597_v40, %v2969_v57 }
 0x62a   :  { %v1600_v54 = vpop.f32.mrb[63].mxu1  ;;  %v1627_v3 = vmul.f32 %v2297_v2, %v2990_v50 }
 0x62b   :  { %v1625_v11 = vmul.f32 %v1600_v54, %v2976_v1 }
 0x62f   :  { %v2324_v9 = vpop.f32.mrb[64].mxu1 }
 0x630   :  { %v1751_v15 = vadd.f32 %v2324_v9, %v1622_v58  ;;  %v1742_v59 = vpop.f32.mrb[65].mxu1 }
 0x631   :  { %v1743_v43 = vadd.f32 %v1742_v59, %v1620_v63  ;;  %v2325_v61 = vpop.f32.mrb[66].mxu1 }
 0x632   :  { %v1789_v17 = vadd.f32 %v3174_v8, %v1751_v15  ;;  %v1754_v10 = vadd.f32 %v2325_v61, %v1623_v25  ;;  %v1745_v26 = vpop.f32.mrb[67].mxu1 }
 0x633   :  { %v1787_v29 = vadd.f32 %v3174_v8, %v1743_v43  ;;  %v1746_v49 = vadd.f32 %v1745_v26, %v1621_v46 }
 0x634   :  { %1805 = vst [vmem:[#allocation13 + $0x50] sm:$0xff] %v1789_v17  ;;  %v1790_v18 = vadd.f32 %v3174_v8, %v1754_v10 }
 0x635   :  { %1803 = vst [vmem:[#allocation13 + $0x40] sm:$0xff] %v1787_v29  ;;  %v1788_v56 = vadd.f32 %v3174_v8, %v1746_v49 }
 0x636   :  { %1806 = vst [vmem:[#allocation13 + $0x58] sm:$0xff] %v1790_v18 }
 0x637   :  { %1804 = vst [vmem:[#allocation13 + $0x48] sm:$0xff] %v1788_v56  ;;  %v2328_v30 = vpop.f32.mrb[68].mxu1 }
 0x638   :  { %v1767_v4 = vadd.f32 %v2328_v30, %v1626_v48  ;;  %v1758_v7 = vpop.f32.mrb[69].mxu1 }
 0x639   :  { %v1759_v12 = vadd.f32 %v1758_v7, %v1624_v60  ;;  %v2329_v13 = vpop.f32.mrb[70].mxu1 }
 0x63a   :  { %v1793_v14 = vadd.f32 %v3174_v8, %v1767_v4  ;;  %v1770_v20 = vadd.f32 %v2329_v13, %v1627_v3  ;;  %v1761_v55 = vpop.f32.mrb[71].mxu1 }
 0x63b   :  { %v1791_v28 = vadd.f32 %v3174_v8, %v1759_v12  ;;  %v1762_v44 = vadd.f32 %v1761_v55, %v1625_v11 }
 0x63c   :  { %1809 = vst [vmem:[#allocation13 + $0x70] sm:$0xff] %v1793_v14  ;;  %v1794_v57 = vadd.f32 %v3174_v8, %v1770_v20 }
 0x63d   :  { %1807 = vst [vmem:[#allocation13 + $0x60] sm:$0xff] %v1791_v28  ;;  %v1792_v50 = vadd.f32 %v3174_v8, %v1762_v44 }
 0x63e   :  { %1810 = vst [vmem:[#allocation13 + $0x78] sm:$0xff] %v1794_v57 }
 0x63f   :  { %1808 = vst [vmem:[#allocation13 + $0x68] sm:$0xff] %v1792_v50 }
 0x640   :  { %2567 = shalt.err (!%p2564_p10)
}
 0x641   :  { %s2568_s30 = scalar_lea.hbm %s3231_s12, 2048 }
 0x642   :  { %p2569_p11 = scmp.ne.s32.totalorder %s3231_s12, %s2568_s30  ;;  %p2572_p12 = scmp.lt.u32.totalorder %s2568_s30, %s3231_s12 }
 0x644   :  { %p2574_p13 = pnand %p2572_p12, %p2569_p11 }
 0x646   :  { %2577 = shalt.err (!%p2574_p13)
}
 0x647   :  { %s2598_s1 = smov 128   ;;  %s2599_s25 = smov 8  }
 0x648   :  { %1822 = dma.vmem_to_hbm [thread:$0]  %s1817_s2, 2048, %s3231_s12, [#allocation4], %s2598_s1, %s2598_s1, %s2599_s25  }
 0x649   :  { %2586 = dma.done.wait [#allocation4], 2048  }
 0x64a   :  { %2587 = vsyncadd [#allocation4], 4294965248 }
 0x64b   :  { %1826 = vsyncpa [#allocation3], 1 }
 0x64c   :  { %1827 = vsyncpa [#allocation6], 1 }
 0x64d   :  { %1828 = vsyncpa [#allocation9], 1 }
 0x64e   :  { %1829 = vsyncpa [#allocation12], 1 }
 0x64f   :  { %1830 = vsyncpa [#allocation4], 1 }

</bundles_post_ra>
